<compile_context>
chip_gen: v6e
topology: v6e:2x2x1
jax: 0.10.0
libtpu: 0.0.40
codegen_flags: <defaults>
</compile_context>

<pallas_src>
import numpy as np
import jax
import jax.numpy as jnp
from jax import lax
from jax.experimental import pallas as pl
from jax.experimental.pallas import tpu as pltpu


# --------------------------- fused forward kernel ---------------------------

def _fused_kernel(x_ref, wih1_ref, whh1_ref, w2_ref, b_lstm_ref,
                  wd1_ref, wd2_ref, b_dense_ref, o_ref):
    """Entire DualInputLSTM forward in one kernel.

    x_ref      : (T, B, Ds+Di) time-major inputs, stock|index on lanes.
    wih1_ref   : (Ds+Di, 4*Hc1) block-diag input weights, layer 1 (both chains).
    whh1_ref   : (Hc1, 4*Hc1)   block-diag recurrent weights, layer 1.
    w2_ref     : (Hc1+Hc2, 4*Hc2) rows [0:Hc1] = h1->gates2, [Hc1:] = h2->gates2.
    b_lstm_ref : (2, 4*Hc1) row 0 = layer-1 bias, row 1 = layer-2 bias (padded).
    wd1_ref    : (2*T*H2, dense_node), wd2_ref : (dense_node, 1)
    b_dense_ref: (2, dense_node) row 0 = bd1, row 1 = [bd2, 0...].
    o_ref      : (B, 1)
    Gate layout everywhere: gates (i, f, g, o) major; inside each gate the
    stock lanes come first, then index lanes.  i/f/o columns are pre-scaled
    by 0.5 host-side (single-tanh sigmoid).
    """
    f32 = jnp.float32
    T, B, _ = x_ref.shape
    Hc1 = whh1_ref.shape[0]            # stock_node + index_node
    G1 = whh1_ref.shape[1]             # 4 * Hc1
    G2 = w2_ref.shape[1]               # 4 * (2 * output_node)
    Hc2 = G2 // 4                      # 2 * output_node
    H2 = Hc2 // 2                      # output_node

    # Hoisted weight / bias loads (read once, reused every step).
    wih1 = wih1_ref[...]
    whh1 = whh1_ref[...]
    w2a = w2_ref[0:Hc1, :]             # h1 -> layer-2 gates (both chains)
    w2b = w2_ref[Hc1:Hc1 + Hc2, :]     # h2 -> layer-2 gates (both chains)
    b1 = b_lstm_ref[0:1, 0:G1]
    b2 = b_lstm_ref[1:2, 0:G2]

    # Single-tanh activation constants: act = tanh(g) * post + off
    #   g-gate lanes: post=1, off=0 (plain tanh)
    #   i/f/o lanes : post=0.5, off=0.5 (sigmoid; the 0.5 input scale is
    #                 already folded into the weights host-side).
    def act_consts(G):
        lane = lax.broadcasted_iota(jnp.int32, (B, G), 1)
        is_g = (lane >= 2 * (G // 4)) & (lane < 3 * (G // 4))
        post = jnp.where(is_g, 1.0, 0.5).astype(f32)
        off = jnp.where(is_g, 0.0, 0.5).astype(f32)
        return post, off

    post1, off1 = act_consts(G1)
    post2, off2 = act_consts(G2)

    h1 = jnp.zeros((B, Hc1), f32)
    c1 = jnp.zeros((B, Hc1), f32)
    h2 = jnp.zeros((B, Hc2), f32)
    c2 = jnp.zeros((B, Hc2), f32)
    hs2 = []   # per-step fused layer-2 hidden states, kept as values (no stores)

    # Fully unrolled T-step recurrence, layer 2 pipelined behind layer 1.
    for t in range(T):
        # Layer 1 (stock ⊕ index, block-diagonal weights).  The x-projection
        # only depends on the input, so the scheduler hoists it off the
        # critical path; only h1 @ whh1 + activations are serial.
        p1 = jnp.dot(x_ref[t], wih1, preferred_element_type=f32) + b1
        g1 = p1 + jnp.dot(h1, whh1, preferred_element_type=f32)
        a1 = jnp.tanh(g1) * post1 + off1
        c1 = a1[:, Hc1:2 * Hc1] * c1 + a1[:, 0:Hc1] * a1[:, 2 * Hc1:3 * Hc1]
        h1 = a1[:, 3 * Hc1:4 * Hc1] * jnp.tanh(c1)

        # Layer 2 (stock ⊕ index), pipelined: consumes h1_t immediately.  The
        # h2_{t-1} @ w2b term is independent of h1_t and overlaps with layer 1.
        g2 = (jnp.dot(h2, w2b, preferred_element_type=f32) + b2 +
              jnp.dot(h1, w2a, preferred_element_type=f32))
        a2 = jnp.tanh(g2) * post2 + off2
        c2 = a2[:, Hc2:2 * Hc2] * c2 + a2[:, 0:Hc2] * a2[:, 2 * Hc2:3 * Hc2]
        h2 = a2[:, 3 * Hc2:4 * Hc2] * jnp.tanh(c2)
        hs2.append(h2)

    # Dense head.  Faithfully reproduces
    #   torch.concat([stock_out, index_out], dim=0).view(B, -1):
    # dense row r is concat-sample 2r then 2r+1, each flattened (t, h)-major.
    # Built once with static lane slices + concats (replaces the previous 28
    # masked misaligned scatter stores inside the recurrence).
    rows = []
    for r in range(B):
        pieces = []
        for half in range(2):
            s_glob = 2 * r + half
            chain = s_glob // B          # 0 = stock, 1 = index
            b = s_glob % B               # batch sample inside that chain
            for t in range(T):
                pieces.append(hs2[t][b:b + 1, chain * H2:(chain + 1) * H2])
        rows.append(jnp.concatenate(pieces, axis=1))      # (1, 2*T*H2)
    dense_in = jnp.concatenate(rows, axis=0)               # (B, 2*T*H2)

    y = jnp.dot(dense_in, wd1_ref[...], preferred_element_type=f32) \
        + b_dense_ref[0:1, :]
    y = jnp.dot(y, wd2_ref[...], preferred_element_type=f32) \
        + b_dense_ref[1:2, 0:1]
    o_ref[...] = y.astype(o_ref.dtype)


# ------------------------------ host wrapper --------------------------------

def _pack_fused_layer(chain_s, chain_i):
    """Pack two parallel per-chain LSTM layers into one block-diagonal layer.

    chain_*: (w_ih (4H,D), w_hh (4H,H), b_ih (4H,), b_hh (4H,)) torch layout.
    Output layout: gates (i,f,g,o) major, [stock | index] inside each gate.
    i/f/o columns are pre-scaled by 0.5 so the kernel can compute sigmoid as
    0.5*tanh(.)+0.5 with a single tanh over the whole gate block (exact:
    scaling by a power of two is lossless in fp32).
    """
    w_ih_s, w_hh_s, b_ih_s, b_hh_s = chain_s
    w_ih_i, w_hh_i, b_ih_i, b_hh_i = chain_i
    f32 = jnp.float32
    Hs, Hi = w_hh_s.shape[1], w_hh_i.shape[1]
    Ds, Di = w_ih_s.shape[1], w_ih_i.shape[1]
    Hc = Hs + Hi

    def gate_block(w_s, w_i, rows_s, rows_i, k):
        top = jnp.concatenate([w_s[k * Hs:(k + 1) * Hs, :].T,
                               jnp.zeros((rows_s, Hi), f32)], axis=1)
        bot = jnp.concatenate([jnp.zeros((rows_i, Hs), f32),
                               w_i[k * Hi:(k + 1) * Hi, :].T], axis=1)
        return jnp.concatenate([top, bot], axis=0)        # (rows_s+rows_i, Hc)

    w_ih = jnp.concatenate([gate_block(w_ih_s, w_ih_i, Ds, Di, k)
                            for k in range(4)], axis=1)    # (Ds+Di, 4*Hc)
    w_hh = jnp.concatenate([gate_block(w_hh_s, w_hh_i, Hs, Hi, k)
                            for k in range(4)], axis=1)    # (Hc, 4*Hc)
    b_s, b_i = b_ih_s + b_hh_s, b_ih_i + b_hh_i
    b = jnp.concatenate(
        [jnp.concatenate([b_s[k * Hs:(k + 1) * Hs], b_i[k * Hi:(k + 1) * Hi]])
         for k in range(4)]).reshape(1, 4 * Hc)

    col = jnp.arange(4 * Hc)
    scale = jnp.where((col >= 2 * Hc) & (col < 3 * Hc), 1.0, 0.5).astype(f32)
    return w_ih * scale, w_hh * scale, b * scale


def _pad_rows(rows, width):
    f32 = jnp.float32
    out = []
    for r in rows:
        r = r.reshape(1, -1).astype(f32)
        if r.shape[1] < width:
            r = jnp.concatenate(
                [r, jnp.zeros((1, width - r.shape[1]), f32)], axis=1)
        out.append(r)
    return jnp.concatenate(out, axis=0)


@jax.jit
def dual_input_lstm_forward(params, stock, index):
    # dropout=0.5 on a single-layer nn.LSTM is a no-op in PyTorch (dropout
    # only applies between stacked layers), so there is nothing to implement.
    B, T, _ = stock.shape

    wih1, whh1, b1 = _pack_fused_layer(params['stock_lstm_1'],
                                       params['index_lstm_1'])
    w2a, w2b, b2 = _pack_fused_layer(params['stock_lstm_2'],
                                     params['index_lstm_2'])
    w2 = jnp.concatenate([w2a, w2b], axis=0)        # (Hc1 + Hc2, 4*Hc2)

    wd1, bd1, wd2, bd2 = params['dense']
    dn = wd1.shape[0]

    b_lstm = _pad_rows([b1, b2], max(b1.shape[1], b2.shape[1]))
    b_dense = _pad_rows([bd1, bd2], dn)

    # Time-major, both chains' features concatenated along lanes.
    x_cat = jnp.transpose(jnp.concatenate([stock, index], axis=2), (1, 0, 2))

    vmem = pl.BlockSpec(memory_space=pltpu.MemorySpace.VMEM)
    out = pl.pallas_call(
        _fused_kernel,
        out_shape=jax.ShapeDtypeStruct((B, 1), stock.dtype),
        in_specs=[vmem] * 8,
        out_specs=vmem,
    )(x_cat, wih1, whh1, w2, b_lstm,
      jnp.transpose(wd1), jnp.transpose(wd2), b_dense)
    return out


# --------------------------- pure-JAX reference ------------------------------

def _lstm_ref(x, w_ih, w_hh, b_ih, b_hh):
    B, T, D = x.shape
    H = w_hh.shape[1]

    def step(carry, x_t):
        h, c = carry
        gates = x_t @ w_ih.T + h @ w_hh.T + b_ih + b_hh
        i, f, g, o = jnp.split(gates, 4, axis=-1)
        i, f, o = jax.nn.sigmoid(i), jax.nn.sigmoid(f), jax.nn.sigmoid(o)
        g = jnp.tanh(g)
        c = f * c + i * g
        h = o * jnp.tanh(c)
        return (h, c), h

    init = (jnp.zeros((B, H), x.dtype), jnp.zeros((B, H), x.dtype))
    _, hs = lax.scan(step, init, jnp.transpose(x, (1, 0, 2)))
    return jnp.transpose(hs, (1, 0, 2))


def reference_forward(params, stock, index):
    s = _lstm_ref(stock, *params['stock_lstm_1'])
    s = _lstm_ref(s, *params['stock_lstm_2'])
    i = _lstm_ref(index, *params['index_lstm_1'])
    i = _lstm_ref(i, *params['index_lstm_2'])
    B = stock.shape[0]
    # Faithful reproduction of torch.concat([s, i]) (dim=0) then .view(B, -1).
    dense_in = jnp.concatenate([s, i], axis=0).reshape(B, -1)
    w1, b1, w2, b2 = params['dense']
    h = dense_in @ w1.T + b1
    return h @ w2.T + b2


# ------------------------------ param init -----------------------------------

def init_params(key, cfg, T):
    def uniform(k, shape, scale):
        return jax.random.uniform(k, shape, jnp.float32, -scale, scale)

    def lstm_params(k, in_dim, hidden):
        k1, k2, k3, k4 = jax.random.split(k, 4)
        s = 1.0 / float(hidden) ** 0.5
        return (uniform(k1, (4 * hidden, in_dim), s),
                uniform(k2, (4 * hidden, hidden), s),
                uniform(k3, (4 * hidden,), s),
                uniform(k4, (4 * hidden,), s))

    ks = jax.random.split(key, 8)
    F = cfg['output_node'] * T * 2
    s1 = 1.0 / float(F) ** 0.5
    s2 = 1.0 / float(cfg['dense_node']) ** 0.5
    return {
        'stock_lstm_1': lstm_params(ks[0], cfg['stock_input'], cfg['stock_node']),
        'stock_lstm_2': lstm_params(ks[1], cfg['stock_node'], cfg['output_node']),
        'index_lstm_1': lstm_params(ks[2], cfg['index_input'], cfg['index_node']),
        'index_lstm_2': lstm_params(ks[3], cfg['index_node'], cfg['output_node']),
        'dense': (uniform(ks[4], (cfg['dense_node'], F), s1),
                  uniform(ks[5], (cfg['dense_node'],), s1),
                  uniform(ks[6], (1, cfg['dense_node']), s2),
                  uniform(ks[7], (1,), s2)),
    }


# ---------------------------------- main -------------------------------------

if __name__ == "__main__":
    cfg = dict(stock_input=4, index_input=3, stock_node=32, index_node=24,
               output_node=16, dense_node=32)
    B, T = 2, 7   # T must be 7: dense in_features = output_node * 7 * 2

    key = jax.random.PRNGKey(0)
    kp, ks, ki = jax.random.split(key, 3)
    params = init_params(kp, cfg, T)
    stock = jax.random.normal(ks, (B, T, cfg['stock_input']), jnp.float32)
    index = jax.random.normal(ki, (B, T, cfg['index_input']), jnp.float32)

    out = jax.block_until_ready(dual_input_lstm_forward(params, stock, index))
    assert out.shape == (B, 1)

    ref = jax.block_until_ready(reference_forward(params, stock, index))
    np.testing.assert_allclose(np.asarray(out), np.asarray(ref),
                               rtol=2e-5, atol=2e-5)
    print("KERNEL_OK")
</pallas_src>

<mosaic_0001>
module attributes {stable_mosaic.version = 11 : i64} {
  func.func @_fused_kernel(%arg0: memref<7x2x7xf32, #tpu.memory_space<vmem>>, %arg1: memref<7x224xf32, #tpu.memory_space<vmem>>, %arg2: memref<56x224xf32, #tpu.memory_space<vmem>>, %arg3: memref<88x128xf32, #tpu.memory_space<vmem>>, %arg4: memref<2x224xf32, #tpu.memory_space<vmem>>, %arg5: memref<224x32xf32, #tpu.memory_space<vmem>>, %arg6: memref<32x1xf32, #tpu.memory_space<vmem>>, %arg7: memref<2x32xf32, #tpu.memory_space<vmem>>, %arg8: memref<2x1xf32, #tpu.memory_space<vmem>>) attributes {dimension_semantics = [], scalar_prefetch = 0 : i64, scratch_operands = 0 : i64, tpu.core_type = #tpu.core_type<tc>} {
    %c0 = arith.constant 0 : index
    %c0_0 = arith.constant 0 : index
    %0 = vector.load %arg1[%c0, %c0_0] : memref<7x224xf32, #tpu.memory_space<vmem>>, vector<7x224xf32>
    %c0_1 = arith.constant 0 : index
    %c0_2 = arith.constant 0 : index
    %1 = vector.load %arg2[%c0_1, %c0_2] : memref<56x224xf32, #tpu.memory_space<vmem>>, vector<56x224xf32>
    %c0_3 = arith.constant 0 : index
    %c0_4 = arith.constant 0 : index
    %2 = vector.load %arg3[%c0_3, %c0_4] : memref<88x128xf32, #tpu.memory_space<vmem>>, vector<56x128xf32>
    %c56 = arith.constant 56 : index
    %c0_5 = arith.constant 0 : index
    %3 = vector.load %arg3[%c56, %c0_5] : memref<88x128xf32, #tpu.memory_space<vmem>>, vector<32x128xf32>
    %c0_6 = arith.constant 0 : index
    %c0_7 = arith.constant 0 : index
    %4 = vector.load %arg4[%c0_6, %c0_7] : memref<2x224xf32, #tpu.memory_space<vmem>>, vector<1x224xf32>
    %c1 = arith.constant 1 : index
    %c0_8 = arith.constant 0 : index
    %5 = vector.load %arg4[%c1, %c0_8] : memref<2x224xf32, #tpu.memory_space<vmem>>, vector<1x128xf32>
    %6 = tpu.iota {dimensions = array<i32: 1>} : vector<2x224xi32>
    %c112_i32 = arith.constant 112 : i32
    %7 = vector.broadcast %c112_i32 : i32 to vector<2x224xi32>
    %8 = arith.cmpi sge, %6, %7 : vector<2x224xi32>
    %c168_i32 = arith.constant 168 : i32
    %9 = vector.broadcast %c168_i32 : i32 to vector<2x224xi32>
    %10 = arith.cmpi slt, %6, %9 : vector<2x224xi32>
    %11 = arith.andi %8, %10 : vector<2x224xi1>
    %cst = arith.constant 1.000000e+00 : f32
    %cst_9 = arith.constant 5.000000e-01 : f32
    %12 = vector.broadcast %cst : f32 to vector<2x224xf32>
    %13 = vector.broadcast %cst_9 : f32 to vector<2x224xf32>
    %14 = arith.select %11, %12, %13 : vector<2x224xi1>, vector<2x224xf32>
    %cst_10 = arith.constant 0.000000e+00 : f32
    %cst_11 = arith.constant 5.000000e-01 : f32
    %15 = vector.broadcast %cst_10 : f32 to vector<2x224xf32>
    %16 = vector.broadcast %cst_11 : f32 to vector<2x224xf32>
    %17 = arith.select %11, %15, %16 : vector<2x224xi1>, vector<2x224xf32>
    %18 = tpu.iota {dimensions = array<i32: 1>} : vector<2x128xi32>
    %c64_i32 = arith.constant 64 : i32
    %19 = vector.broadcast %c64_i32 : i32 to vector<2x128xi32>
    %20 = arith.cmpi sge, %18, %19 : vector<2x128xi32>
    %c96_i32 = arith.constant 96 : i32
    %21 = vector.broadcast %c96_i32 : i32 to vector<2x128xi32>
    %22 = arith.cmpi slt, %18, %21 : vector<2x128xi32>
    %23 = arith.andi %20, %22 : vector<2x128xi1>
    %cst_12 = arith.constant 1.000000e+00 : f32
    %cst_13 = arith.constant 5.000000e-01 : f32
    %24 = vector.broadcast %cst_12 : f32 to vector<2x128xf32>
    %25 = vector.broadcast %cst_13 : f32 to vector<2x128xf32>
    %26 = arith.select %23, %24, %25 : vector<2x128xi1>, vector<2x128xf32>
    %cst_14 = arith.constant 0.000000e+00 : f32
    %cst_15 = arith.constant 5.000000e-01 : f32
    %27 = vector.broadcast %cst_14 : f32 to vector<2x128xf32>
    %28 = vector.broadcast %cst_15 : f32 to vector<2x128xf32>
    %29 = arith.select %23, %27, %28 : vector<2x128xi1>, vector<2x128xf32>
    %cst_16 = arith.constant 0.000000e+00 : f32
    %30 = vector.broadcast %cst_16 : f32 to vector<2x56xf32>
    %cst_17 = arith.constant 0.000000e+00 : f32
    %31 = vector.broadcast %cst_17 : f32 to vector<2x56xf32>
    %cst_18 = arith.constant 0.000000e+00 : f32
    %32 = vector.broadcast %cst_18 : f32 to vector<2x32xf32>
    %cst_19 = arith.constant 0.000000e+00 : f32
    %33 = vector.broadcast %cst_19 : f32 to vector<2x32xf32>
    %c0_20 = arith.constant 0 : index
    %c0_21 = arith.constant 0 : index
    %c0_22 = arith.constant 0 : index
    %34 = vector.load %arg0[%c0_20, %c0_21, %c0_22] : memref<7x2x7xf32, #tpu.memory_space<vmem>>, vector<1x2x7xf32>
    %35 = vector.shape_cast %34 : vector<1x2x7xf32> to vector<2x7xf32>
    %cst_23 = arith.constant dense<0.000000e+00> : vector<2x224xf32>
    %36 = tpu.matmul %35, %0, %cst_23 {dimension_numbers = #tpu.dot_dimension_numbers<[1], [0], [0], [1], [0, 0, 1, 1], [], []>} : vector<2x7xf32>, vector<7x224xf32>, vector<2x224xf32> -> vector<2x224xf32>
    %37 = vector.broadcast %4 : vector<1x224xf32> to vector<2x224xf32>
    %38 = arith.addf %36, %37 : vector<2x224xf32>
    %cst_24 = arith.constant dense<0.000000e+00> : vector<2x224xf32>
    %39 = tpu.matmul %30, %1, %cst_24 {dimension_numbers = #tpu.dot_dimension_numbers<[1], [0], [0], [1], [0, 0, 1, 1], [], []>} : vector<2x56xf32>, vector<56x224xf32>, vector<2x224xf32> -> vector<2x224xf32>
    %40 = arith.addf %38, %39 : vector<2x224xf32>
    %41 = math.tanh %40 : vector<2x224xf32>
    %42 = arith.mulf %41, %14 : vector<2x224xf32>
    %43 = arith.addf %42, %17 : vector<2x224xf32>
    %44 = vector.extract_strided_slice %43 {offsets = [0, 56], sizes = [2, 56], strides = [1, 1]} : vector<2x224xf32> to vector<2x56xf32>
    %45 = arith.mulf %44, %31 : vector<2x56xf32>
    %46 = vector.extract_strided_slice %43 {offsets = [0, 0], sizes = [2, 56], strides = [1, 1]} : vector<2x224xf32> to vector<2x56xf32>
    %47 = vector.extract_strided_slice %43 {offsets = [0, 112], sizes = [2, 56], strides = [1, 1]} : vector<2x224xf32> to vector<2x56xf32>
    %48 = arith.mulf %46, %47 : vector<2x56xf32>
    %49 = arith.addf %45, %48 : vector<2x56xf32>
    %50 = vector.extract_strided_slice %43 {offsets = [0, 168], sizes = [2, 56], strides = [1, 1]} : vector<2x224xf32> to vector<2x56xf32>
    %51 = math.tanh %49 : vector<2x56xf32>
    %52 = arith.mulf %50, %51 : vector<2x56xf32>
    %cst_25 = arith.constant dense<0.000000e+00> : vector<2x128xf32>
    %53 = tpu.matmul %32, %3, %cst_25 {dimension_numbers = #tpu.dot_dimension_numbers<[1], [0], [0], [1], [0, 0, 1, 1], [], []>} : vector<2x32xf32>, vector<32x128xf32>, vector<2x128xf32> -> vector<2x128xf32>
    %54 = vector.broadcast %5 : vector<1x128xf32> to vector<2x128xf32>
    %55 = arith.addf %53, %54 : vector<2x128xf32>
    %cst_26 = arith.constant dense<0.000000e+00> : vector<2x128xf32>
    %56 = tpu.matmul %52, %2, %cst_26 {dimension_numbers = #tpu.dot_dimension_numbers<[1], [0], [0], [1], [0, 0, 1, 1], [], []>} : vector<2x56xf32>, vector<56x128xf32>, vector<2x128xf32> -> vector<2x128xf32>
    %57 = arith.addf %55, %56 : vector<2x128xf32>
    %58 = math.tanh %57 : vector<2x128xf32>
    %59 = arith.mulf %58, %26 : vector<2x128xf32>
    %60 = arith.addf %59, %29 : vector<2x128xf32>
    %61 = vector.extract_strided_slice %60 {offsets = [0, 32], sizes = [2, 32], strides = [1, 1]} : vector<2x128xf32> to vector<2x32xf32>
    %62 = arith.mulf %61, %33 : vector<2x32xf32>
    %63 = vector.extract_strided_slice %60 {offsets = [0, 0], sizes = [2, 32], strides = [1, 1]} : vector<2x128xf32> to vector<2x32xf32>
    %64 = vector.extract_strided_slice %60 {offsets = [0, 64], sizes = [2, 32], strides = [1, 1]} : vector<2x128xf32> to vector<2x32xf32>
    %65 = arith.mulf %63, %64 : vector<2x32xf32>
    %66 = arith.addf %62, %65 : vector<2x32xf32>
    %67 = vector.extract_strided_slice %60 {offsets = [0, 96], sizes = [2, 32], strides = [1, 1]} : vector<2x128xf32> to vector<2x32xf32>
    %68 = math.tanh %66 : vector<2x32xf32>
    %69 = arith.mulf %67, %68 : vector<2x32xf32>
    %c1_27 = arith.constant 1 : index
    %c0_28 = arith.constant 0 : index
    %c0_29 = arith.constant 0 : index
    %70 = vector.load %arg0[%c1_27, %c0_28, %c0_29] : memref<7x2x7xf32, #tpu.memory_space<vmem>>, vector<1x2x7xf32>
    %71 = vector.shape_cast %70 : vector<1x2x7xf32> to vector<2x7xf32>
    %cst_30 = arith.constant dense<0.000000e+00> : vector<2x224xf32>
    %72 = tpu.matmul %71, %0, %cst_30 {dimension_numbers = #tpu.dot_dimension_numbers<[1], [0], [0], [1], [0, 0, 1, 1], [], []>} : vector<2x7xf32>, vector<7x224xf32>, vector<2x224xf32> -> vector<2x224xf32>
    %73 = vector.broadcast %4 : vector<1x224xf32> to vector<2x224xf32>
    %74 = arith.addf %72, %73 : vector<2x224xf32>
    %cst_31 = arith.constant dense<0.000000e+00> : vector<2x224xf32>
    %75 = tpu.matmul %52, %1, %cst_31 {dimension_numbers = #tpu.dot_dimension_numbers<[1], [0], [0], [1], [0, 0, 1, 1], [], []>} : vector<2x56xf32>, vector<56x224xf32>, vector<2x224xf32> -> vector<2x224xf32>
    %76 = arith.addf %74, %75 : vector<2x224xf32>
    %77 = math.tanh %76 : vector<2x224xf32>
    %78 = arith.mulf %77, %14 : vector<2x224xf32>
    %79 = arith.addf %78, %17 : vector<2x224xf32>
    %80 = vector.extract_strided_slice %79 {offsets = [0, 56], sizes = [2, 56], strides = [1, 1]} : vector<2x224xf32> to vector<2x56xf32>
    %81 = arith.mulf %80, %49 : vector<2x56xf32>
    %82 = vector.extract_strided_slice %79 {offsets = [0, 0], sizes = [2, 56], strides = [1, 1]} : vector<2x224xf32> to vector<2x56xf32>
    %83 = vector.extract_strided_slice %79 {offsets = [0, 112], sizes = [2, 56], strides = [1, 1]} : vector<2x224xf32> to vector<2x56xf32>
    %84 = arith.mulf %82, %83 : vector<2x56xf32>
    %85 = arith.addf %81, %84 : vector<2x56xf32>
    %86 = vector.extract_strided_slice %79 {offsets = [0, 168], sizes = [2, 56], strides = [1, 1]} : vector<2x224xf32> to vector<2x56xf32>
    %87 = math.tanh %85 : vector<2x56xf32>
    %88 = arith.mulf %86, %87 : vector<2x56xf32>
    %cst_32 = arith.constant dense<0.000000e+00> : vector<2x128xf32>
    %89 = tpu.matmul %69, %3, %cst_32 {dimension_numbers = #tpu.dot_dimension_numbers<[1], [0], [0], [1], [0, 0, 1, 1], [], []>} : vector<2x32xf32>, vector<32x128xf32>, vector<2x128xf32> -> vector<2x128xf32>
    %90 = vector.broadcast %5 : vector<1x128xf32> to vector<2x128xf32>
    %91 = arith.addf %89, %90 : vector<2x128xf32>
    %cst_33 = arith.constant dense<0.000000e+00> : vector<2x128xf32>
    %92 = tpu.matmul %88, %2, %cst_33 {dimension_numbers = #tpu.dot_dimension_numbers<[1], [0], [0], [1], [0, 0, 1, 1], [], []>} : vector<2x56xf32>, vector<56x128xf32>, vector<2x128xf32> -> vector<2x128xf32>
    %93 = arith.addf %91, %92 : vector<2x128xf32>
    %94 = math.tanh %93 : vector<2x128xf32>
    %95 = arith.mulf %94, %26 : vector<2x128xf32>
    %96 = arith.addf %95, %29 : vector<2x128xf32>
    %97 = vector.extract_strided_slice %96 {offsets = [0, 32], sizes = [2, 32], strides = [1, 1]} : vector<2x128xf32> to vector<2x32xf32>
    %98 = arith.mulf %97, %66 : vector<2x32xf32>
    %99 = vector.extract_strided_slice %96 {offsets = [0, 0], sizes = [2, 32], strides = [1, 1]} : vector<2x128xf32> to vector<2x32xf32>
    %100 = vector.extract_strided_slice %96 {offsets = [0, 64], sizes = [2, 32], strides = [1, 1]} : vector<2x128xf32> to vector<2x32xf32>
    %101 = arith.mulf %99, %100 : vector<2x32xf32>
    %102 = arith.addf %98, %101 : vector<2x32xf32>
    %103 = vector.extract_strided_slice %96 {offsets = [0, 96], sizes = [2, 32], strides = [1, 1]} : vector<2x128xf32> to vector<2x32xf32>
    %104 = math.tanh %102 : vector<2x32xf32>
    %105 = arith.mulf %103, %104 : vector<2x32xf32>
    %c2 = arith.constant 2 : index
    %c0_34 = arith.constant 0 : index
    %c0_35 = arith.constant 0 : index
    %106 = vector.load %arg0[%c2, %c0_34, %c0_35] : memref<7x2x7xf32, #tpu.memory_space<vmem>>, vector<1x2x7xf32>
    %107 = vector.shape_cast %106 : vector<1x2x7xf32> to vector<2x7xf32>
    %cst_36 = arith.constant dense<0.000000e+00> : vector<2x224xf32>
    %108 = tpu.matmul %107, %0, %cst_36 {dimension_numbers = #tpu.dot_dimension_numbers<[1], [0], [0], [1], [0, 0, 1, 1], [], []>} : vector<2x7xf32>, vector<7x224xf32>, vector<2x224xf32> -> vector<2x224xf32>
    %109 = vector.broadcast %4 : vector<1x224xf32> to vector<2x224xf32>
    %110 = arith.addf %108, %109 : vector<2x224xf32>
    %cst_37 = arith.constant dense<0.000000e+00> : vector<2x224xf32>
    %111 = tpu.matmul %88, %1, %cst_37 {dimension_numbers = #tpu.dot_dimension_numbers<[1], [0], [0], [1], [0, 0, 1, 1], [], []>} : vector<2x56xf32>, vector<56x224xf32>, vector<2x224xf32> -> vector<2x224xf32>
    %112 = arith.addf %110, %111 : vector<2x224xf32>
    %113 = math.tanh %112 : vector<2x224xf32>
    %114 = arith.mulf %113, %14 : vector<2x224xf32>
    %115 = arith.addf %114, %17 : vector<2x224xf32>
    %116 = vector.extract_strided_slice %115 {offsets = [0, 56], sizes = [2, 56], strides = [1, 1]} : vector<2x224xf32> to vector<2x56xf32>
    %117 = arith.mulf %116, %85 : vector<2x56xf32>
    %118 = vector.extract_strided_slice %115 {offsets = [0, 0], sizes = [2, 56], strides = [1, 1]} : vector<2x224xf32> to vector<2x56xf32>
    %119 = vector.extract_strided_slice %115 {offsets = [0, 112], sizes = [2, 56], strides = [1, 1]} : vector<2x224xf32> to vector<2x56xf32>
    %120 = arith.mulf %118, %119 : vector<2x56xf32>
    %121 = arith.addf %117, %120 : vector<2x56xf32>
    %122 = vector.extract_strided_slice %115 {offsets = [0, 168], sizes = [2, 56], strides = [1, 1]} : vector<2x224xf32> to vector<2x56xf32>
    %123 = math.tanh %121 : vector<2x56xf32>
    %124 = arith.mulf %122, %123 : vector<2x56xf32>
    %cst_38 = arith.constant dense<0.000000e+00> : vector<2x128xf32>
    %125 = tpu.matmul %105, %3, %cst_38 {dimension_numbers = #tpu.dot_dimension_numbers<[1], [0], [0], [1], [0, 0, 1, 1], [], []>} : vector<2x32xf32>, vector<32x128xf32>, vector<2x128xf32> -> vector<2x128xf32>
    %126 = vector.broadcast %5 : vector<1x128xf32> to vector<2x128xf32>
    %127 = arith.addf %125, %126 : vector<2x128xf32>
    %cst_39 = arith.constant dense<0.000000e+00> : vector<2x128xf32>
    %128 = tpu.matmul %124, %2, %cst_39 {dimension_numbers = #tpu.dot_dimension_numbers<[1], [0], [0], [1], [0, 0, 1, 1], [], []>} : vector<2x56xf32>, vector<56x128xf32>, vector<2x128xf32> -> vector<2x128xf32>
    %129 = arith.addf %127, %128 : vector<2x128xf32>
    %130 = math.tanh %129 : vector<2x128xf32>
    %131 = arith.mulf %130, %26 : vector<2x128xf32>
    %132 = arith.addf %131, %29 : vector<2x128xf32>
    %133 = vector.extract_strided_slice %132 {offsets = [0, 32], sizes = [2, 32], strides = [1, 1]} : vector<2x128xf32> to vector<2x32xf32>
    %134 = arith.mulf %133, %102 : vector<2x32xf32>
    %135 = vector.extract_strided_slice %132 {offsets = [0, 0], sizes = [2, 32], strides = [1, 1]} : vector<2x128xf32> to vector<2x32xf32>
    %136 = vector.extract_strided_slice %132 {offsets = [0, 64], sizes = [2, 32], strides = [1, 1]} : vector<2x128xf32> to vector<2x32xf32>
    %137 = arith.mulf %135, %136 : vector<2x32xf32>
    %138 = arith.addf %134, %137 : vector<2x32xf32>
    %139 = vector.extract_strided_slice %132 {offsets = [0, 96], sizes = [2, 32], strides = [1, 1]} : vector<2x128xf32> to vector<2x32xf32>
    %140 = math.tanh %138 : vector<2x32xf32>
    %141 = arith.mulf %139, %140 : vector<2x32xf32>
    %c3 = arith.constant 3 : index
    %c0_40 = arith.constant 0 : index
    %c0_41 = arith.constant 0 : index
    %142 = vector.load %arg0[%c3, %c0_40, %c0_41] : memref<7x2x7xf32, #tpu.memory_space<vmem>>, vector<1x2x7xf32>
    %143 = vector.shape_cast %142 : vector<1x2x7xf32> to vector<2x7xf32>
    %cst_42 = arith.constant dense<0.000000e+00> : vector<2x224xf32>
    %144 = tpu.matmul %143, %0, %cst_42 {dimension_numbers = #tpu.dot_dimension_numbers<[1], [0], [0], [1], [0, 0, 1, 1], [], []>} : vector<2x7xf32>, vector<7x224xf32>, vector<2x224xf32> -> vector<2x224xf32>
    %145 = vector.broadcast %4 : vector<1x224xf32> to vector<2x224xf32>
    %146 = arith.addf %144, %145 : vector<2x224xf32>
    %cst_43 = arith.constant dense<0.000000e+00> : vector<2x224xf32>
    %147 = tpu.matmul %124, %1, %cst_43 {dimension_numbers = #tpu.dot_dimension_numbers<[1], [0], [0], [1], [0, 0, 1, 1], [], []>} : vector<2x56xf32>, vector<56x224xf32>, vector<2x224xf32> -> vector<2x224xf32>
    %148 = arith.addf %146, %147 : vector<2x224xf32>
    %149 = math.tanh %148 : vector<2x224xf32>
    %150 = arith.mulf %149, %14 : vector<2x224xf32>
    %151 = arith.addf %150, %17 : vector<2x224xf32>
    %152 = vector.extract_strided_slice %151 {offsets = [0, 56], sizes = [2, 56], strides = [1, 1]} : vector<2x224xf32> to vector<2x56xf32>
    %153 = arith.mulf %152, %121 : vector<2x56xf32>
    %154 = vector.extract_strided_slice %151 {offsets = [0, 0], sizes = [2, 56], strides = [1, 1]} : vector<2x224xf32> to vector<2x56xf32>
    %155 = vector.extract_strided_slice %151 {offsets = [0, 112], sizes = [2, 56], strides = [1, 1]} : vector<2x224xf32> to vector<2x56xf32>
    %156 = arith.mulf %154, %155 : vector<2x56xf32>
    %157 = arith.addf %153, %156 : vector<2x56xf32>
    %158 = vector.extract_strided_slice %151 {offsets = [0, 168], sizes = [2, 56], strides = [1, 1]} : vector<2x224xf32> to vector<2x56xf32>
    %159 = math.tanh %157 : vector<2x56xf32>
    %160 = arith.mulf %158, %159 : vector<2x56xf32>
    %cst_44 = arith.constant dense<0.000000e+00> : vector<2x128xf32>
    %161 = tpu.matmul %141, %3, %cst_44 {dimension_numbers = #tpu.dot_dimension_numbers<[1], [0], [0], [1], [0, 0, 1, 1], [], []>} : vector<2x32xf32>, vector<32x128xf32>, vector<2x128xf32> -> vector<2x128xf32>
    %162 = vector.broadcast %5 : vector<1x128xf32> to vector<2x128xf32>
    %163 = arith.addf %161, %162 : vector<2x128xf32>
    %cst_45 = arith.constant dense<0.000000e+00> : vector<2x128xf32>
    %164 = tpu.matmul %160, %2, %cst_45 {dimension_numbers = #tpu.dot_dimension_numbers<[1], [0], [0], [1], [0, 0, 1, 1], [], []>} : vector<2x56xf32>, vector<56x128xf32>, vector<2x128xf32> -> vector<2x128xf32>
    %165 = arith.addf %163, %164 : vector<2x128xf32>
    %166 = math.tanh %165 : vector<2x128xf32>
    %167 = arith.mulf %166, %26 : vector<2x128xf32>
    %168 = arith.addf %167, %29 : vector<2x128xf32>
    %169 = vector.extract_strided_slice %168 {offsets = [0, 32], sizes = [2, 32], strides = [1, 1]} : vector<2x128xf32> to vector<2x32xf32>
    %170 = arith.mulf %169, %138 : vector<2x32xf32>
    %171 = vector.extract_strided_slice %168 {offsets = [0, 0], sizes = [2, 32], strides = [1, 1]} : vector<2x128xf32> to vector<2x32xf32>
    %172 = vector.extract_strided_slice %168 {offsets = [0, 64], sizes = [2, 32], strides = [1, 1]} : vector<2x128xf32> to vector<2x32xf32>
    %173 = arith.mulf %171, %172 : vector<2x32xf32>
    %174 = arith.addf %170, %173 : vector<2x32xf32>
    %175 = vector.extract_strided_slice %168 {offsets = [0, 96], sizes = [2, 32], strides = [1, 1]} : vector<2x128xf32> to vector<2x32xf32>
    %176 = math.tanh %174 : vector<2x32xf32>
    %177 = arith.mulf %175, %176 : vector<2x32xf32>
    %c4 = arith.constant 4 : index
    %c0_46 = arith.constant 0 : index
    %c0_47 = arith.constant 0 : index
    %178 = vector.load %arg0[%c4, %c0_46, %c0_47] : memref<7x2x7xf32, #tpu.memory_space<vmem>>, vector<1x2x7xf32>
    %179 = vector.shape_cast %178 : vector<1x2x7xf32> to vector<2x7xf32>
    %cst_48 = arith.constant dense<0.000000e+00> : vector<2x224xf32>
    %180 = tpu.matmul %179, %0, %cst_48 {dimension_numbers = #tpu.dot_dimension_numbers<[1], [0], [0], [1], [0, 0, 1, 1], [], []>} : vector<2x7xf32>, vector<7x224xf32>, vector<2x224xf32> -> vector<2x224xf32>
    %181 = vector.broadcast %4 : vector<1x224xf32> to vector<2x224xf32>
    %182 = arith.addf %180, %181 : vector<2x224xf32>
    %cst_49 = arith.constant dense<0.000000e+00> : vector<2x224xf32>
    %183 = tpu.matmul %160, %1, %cst_49 {dimension_numbers = #tpu.dot_dimension_numbers<[1], [0], [0], [1], [0, 0, 1, 1], [], []>} : vector<2x56xf32>, vector<56x224xf32>, vector<2x224xf32> -> vector<2x224xf32>
    %184 = arith.addf %182, %183 : vector<2x224xf32>
    %185 = math.tanh %184 : vector<2x224xf32>
    %186 = arith.mulf %185, %14 : vector<2x224xf32>
    %187 = arith.addf %186, %17 : vector<2x224xf32>
    %188 = vector.extract_strided_slice %187 {offsets = [0, 56], sizes = [2, 56], strides = [1, 1]} : vector<2x224xf32> to vector<2x56xf32>
    %189 = arith.mulf %188, %157 : vector<2x56xf32>
    %190 = vector.extract_strided_slice %187 {offsets = [0, 0], sizes = [2, 56], strides = [1, 1]} : vector<2x224xf32> to vector<2x56xf32>
    %191 = vector.extract_strided_slice %187 {offsets = [0, 112], sizes = [2, 56], strides = [1, 1]} : vector<2x224xf32> to vector<2x56xf32>
    %192 = arith.mulf %190, %191 : vector<2x56xf32>
    %193 = arith.addf %189, %192 : vector<2x56xf32>
    %194 = vector.extract_strided_slice %187 {offsets = [0, 168], sizes = [2, 56], strides = [1, 1]} : vector<2x224xf32> to vector<2x56xf32>
    %195 = math.tanh %193 : vector<2x56xf32>
    %196 = arith.mulf %194, %195 : vector<2x56xf32>
    %cst_50 = arith.constant dense<0.000000e+00> : vector<2x128xf32>
    %197 = tpu.matmul %177, %3, %cst_50 {dimension_numbers = #tpu.dot_dimension_numbers<[1], [0], [0], [1], [0, 0, 1, 1], [], []>} : vector<2x32xf32>, vector<32x128xf32>, vector<2x128xf32> -> vector<2x128xf32>
    %198 = vector.broadcast %5 : vector<1x128xf32> to vector<2x128xf32>
    %199 = arith.addf %197, %198 : vector<2x128xf32>
    %cst_51 = arith.constant dense<0.000000e+00> : vector<2x128xf32>
    %200 = tpu.matmul %196, %2, %cst_51 {dimension_numbers = #tpu.dot_dimension_numbers<[1], [0], [0], [1], [0, 0, 1, 1], [], []>} : vector<2x56xf32>, vector<56x128xf32>, vector<2x128xf32> -> vector<2x128xf32>
    %201 = arith.addf %199, %200 : vector<2x128xf32>
    %202 = math.tanh %201 : vector<2x128xf32>
    %203 = arith.mulf %202, %26 : vector<2x128xf32>
    %204 = arith.addf %203, %29 : vector<2x128xf32>
    %205 = vector.extract_strided_slice %204 {offsets = [0, 32], sizes = [2, 32], strides = [1, 1]} : vector<2x128xf32> to vector<2x32xf32>
    %206 = arith.mulf %205, %174 : vector<2x32xf32>
    %207 = vector.extract_strided_slice %204 {offsets = [0, 0], sizes = [2, 32], strides = [1, 1]} : vector<2x128xf32> to vector<2x32xf32>
    %208 = vector.extract_strided_slice %204 {offsets = [0, 64], sizes = [2, 32], strides = [1, 1]} : vector<2x128xf32> to vector<2x32xf32>
    %209 = arith.mulf %207, %208 : vector<2x32xf32>
    %210 = arith.addf %206, %209 : vector<2x32xf32>
    %211 = vector.extract_strided_slice %204 {offsets = [0, 96], sizes = [2, 32], strides = [1, 1]} : vector<2x128xf32> to vector<2x32xf32>
    %212 = math.tanh %210 : vector<2x32xf32>
    %213 = arith.mulf %211, %212 : vector<2x32xf32>
    %c5 = arith.constant 5 : index
    %c0_52 = arith.constant 0 : index
    %c0_53 = arith.constant 0 : index
    %214 = vector.load %arg0[%c5, %c0_52, %c0_53] : memref<7x2x7xf32, #tpu.memory_space<vmem>>, vector<1x2x7xf32>
    %215 = vector.shape_cast %214 : vector<1x2x7xf32> to vector<2x7xf32>
    %cst_54 = arith.constant dense<0.000000e+00> : vector<2x224xf32>
    %216 = tpu.matmul %215, %0, %cst_54 {dimension_numbers = #tpu.dot_dimension_numbers<[1], [0], [0], [1], [0, 0, 1, 1], [], []>} : vector<2x7xf32>, vector<7x224xf32>, vector<2x224xf32> -> vector<2x224xf32>
    %217 = vector.broadcast %4 : vector<1x224xf32> to vector<2x224xf32>
    %218 = arith.addf %216, %217 : vector<2x224xf32>
    %cst_55 = arith.constant dense<0.000000e+00> : vector<2x224xf32>
    %219 = tpu.matmul %196, %1, %cst_55 {dimension_numbers = #tpu.dot_dimension_numbers<[1], [0], [0], [1], [0, 0, 1, 1], [], []>} : vector<2x56xf32>, vector<56x224xf32>, vector<2x224xf32> -> vector<2x224xf32>
    %220 = arith.addf %218, %219 : vector<2x224xf32>
    %221 = math.tanh %220 : vector<2x224xf32>
    %222 = arith.mulf %221, %14 : vector<2x224xf32>
    %223 = arith.addf %222, %17 : vector<2x224xf32>
    %224 = vector.extract_strided_slice %223 {offsets = [0, 56], sizes = [2, 56], strides = [1, 1]} : vector<2x224xf32> to vector<2x56xf32>
    %225 = arith.mulf %224, %193 : vector<2x56xf32>
    %226 = vector.extract_strided_slice %223 {offsets = [0, 0], sizes = [2, 56], strides = [1, 1]} : vector<2x224xf32> to vector<2x56xf32>
    %227 = vector.extract_strided_slice %223 {offsets = [0, 112], sizes = [2, 56], strides = [1, 1]} : vector<2x224xf32> to vector<2x56xf32>
    %228 = arith.mulf %226, %227 : vector<2x56xf32>
    %229 = arith.addf %225, %228 : vector<2x56xf32>
    %230 = vector.extract_strided_slice %223 {offsets = [0, 168], sizes = [2, 56], strides = [1, 1]} : vector<2x224xf32> to vector<2x56xf32>
    %231 = math.tanh %229 : vector<2x56xf32>
    %232 = arith.mulf %230, %231 : vector<2x56xf32>
    %cst_56 = arith.constant dense<0.000000e+00> : vector<2x128xf32>
    %233 = tpu.matmul %213, %3, %cst_56 {dimension_numbers = #tpu.dot_dimension_numbers<[1], [0], [0], [1], [0, 0, 1, 1], [], []>} : vector<2x32xf32>, vector<32x128xf32>, vector<2x128xf32> -> vector<2x128xf32>
    %234 = vector.broadcast %5 : vector<1x128xf32> to vector<2x128xf32>
    %235 = arith.addf %233, %234 : vector<2x128xf32>
    %cst_57 = arith.constant dense<0.000000e+00> : vector<2x128xf32>
    %236 = tpu.matmul %232, %2, %cst_57 {dimension_numbers = #tpu.dot_dimension_numbers<[1], [0], [0], [1], [0, 0, 1, 1], [], []>} : vector<2x56xf32>, vector<56x128xf32>, vector<2x128xf32> -> vector<2x128xf32>
    %237 = arith.addf %235, %236 : vector<2x128xf32>
    %238 = math.tanh %237 : vector<2x128xf32>
    %239 = arith.mulf %238, %26 : vector<2x128xf32>
    %240 = arith.addf %239, %29 : vector<2x128xf32>
    %241 = vector.extract_strided_slice %240 {offsets = [0, 32], sizes = [2, 32], strides = [1, 1]} : vector<2x128xf32> to vector<2x32xf32>
    %242 = arith.mulf %241, %210 : vector<2x32xf32>
    %243 = vector.extract_strided_slice %240 {offsets = [0, 0], sizes = [2, 32], strides = [1, 1]} : vector<2x128xf32> to vector<2x32xf32>
    %244 = vector.extract_strided_slice %240 {offsets = [0, 64], sizes = [2, 32], strides = [1, 1]} : vector<2x128xf32> to vector<2x32xf32>
    %245 = arith.mulf %243, %244 : vector<2x32xf32>
    %246 = arith.addf %242, %245 : vector<2x32xf32>
    %247 = vector.extract_strided_slice %240 {offsets = [0, 96], sizes = [2, 32], strides = [1, 1]} : vector<2x128xf32> to vector<2x32xf32>
    %248 = math.tanh %246 : vector<2x32xf32>
    %249 = arith.mulf %247, %248 : vector<2x32xf32>
    %c6 = arith.constant 6 : index
    %c0_58 = arith.constant 0 : index
    %c0_59 = arith.constant 0 : index
    %250 = vector.load %arg0[%c6, %c0_58, %c0_59] : memref<7x2x7xf32, #tpu.memory_space<vmem>>, vector<1x2x7xf32>
    %251 = vector.shape_cast %250 : vector<1x2x7xf32> to vector<2x7xf32>
    %cst_60 = arith.constant dense<0.000000e+00> : vector<2x224xf32>
    %252 = tpu.matmul %251, %0, %cst_60 {dimension_numbers = #tpu.dot_dimension_numbers<[1], [0], [0], [1], [0, 0, 1, 1], [], []>} : vector<2x7xf32>, vector<7x224xf32>, vector<2x224xf32> -> vector<2x224xf32>
    %253 = vector.broadcast %4 : vector<1x224xf32> to vector<2x224xf32>
    %254 = arith.addf %252, %253 : vector<2x224xf32>
    %cst_61 = arith.constant dense<0.000000e+00> : vector<2x224xf32>
    %255 = tpu.matmul %232, %1, %cst_61 {dimension_numbers = #tpu.dot_dimension_numbers<[1], [0], [0], [1], [0, 0, 1, 1], [], []>} : vector<2x56xf32>, vector<56x224xf32>, vector<2x224xf32> -> vector<2x224xf32>
    %256 = arith.addf %254, %255 : vector<2x224xf32>
    %257 = math.tanh %256 : vector<2x224xf32>
    %258 = arith.mulf %257, %14 : vector<2x224xf32>
    %259 = arith.addf %258, %17 : vector<2x224xf32>
    %260 = vector.extract_strided_slice %259 {offsets = [0, 56], sizes = [2, 56], strides = [1, 1]} : vector<2x224xf32> to vector<2x56xf32>
    %261 = arith.mulf %260, %229 : vector<2x56xf32>
    %262 = vector.extract_strided_slice %259 {offsets = [0, 0], sizes = [2, 56], strides = [1, 1]} : vector<2x224xf32> to vector<2x56xf32>
    %263 = vector.extract_strided_slice %259 {offsets = [0, 112], sizes = [2, 56], strides = [1, 1]} : vector<2x224xf32> to vector<2x56xf32>
    %264 = arith.mulf %262, %263 : vector<2x56xf32>
    %265 = arith.addf %261, %264 : vector<2x56xf32>
    %266 = vector.extract_strided_slice %259 {offsets = [0, 168], sizes = [2, 56], strides = [1, 1]} : vector<2x224xf32> to vector<2x56xf32>
    %267 = math.tanh %265 : vector<2x56xf32>
    %268 = arith.mulf %266, %267 : vector<2x56xf32>
    %cst_62 = arith.constant dense<0.000000e+00> : vector<2x128xf32>
    %269 = tpu.matmul %249, %3, %cst_62 {dimension_numbers = #tpu.dot_dimension_numbers<[1], [0], [0], [1], [0, 0, 1, 1], [], []>} : vector<2x32xf32>, vector<32x128xf32>, vector<2x128xf32> -> vector<2x128xf32>
    %270 = vector.broadcast %5 : vector<1x128xf32> to vector<2x128xf32>
    %271 = arith.addf %269, %270 : vector<2x128xf32>
    %cst_63 = arith.constant dense<0.000000e+00> : vector<2x128xf32>
    %272 = tpu.matmul %268, %2, %cst_63 {dimension_numbers = #tpu.dot_dimension_numbers<[1], [0], [0], [1], [0, 0, 1, 1], [], []>} : vector<2x56xf32>, vector<56x128xf32>, vector<2x128xf32> -> vector<2x128xf32>
    %273 = arith.addf %271, %272 : vector<2x128xf32>
    %274 = math.tanh %273 : vector<2x128xf32>
    %275 = arith.mulf %274, %26 : vector<2x128xf32>
    %276 = arith.addf %275, %29 : vector<2x128xf32>
    %277 = vector.extract_strided_slice %276 {offsets = [0, 32], sizes = [2, 32], strides = [1, 1]} : vector<2x128xf32> to vector<2x32xf32>
    %278 = arith.mulf %277, %246 : vector<2x32xf32>
    %279 = vector.extract_strided_slice %276 {offsets = [0, 0], sizes = [2, 32], strides = [1, 1]} : vector<2x128xf32> to vector<2x32xf32>
    %280 = vector.extract_strided_slice %276 {offsets = [0, 64], sizes = [2, 32], strides = [1, 1]} : vector<2x128xf32> to vector<2x32xf32>
    %281 = arith.mulf %279, %280 : vector<2x32xf32>
    %282 = arith.addf %278, %281 : vector<2x32xf32>
    %283 = vector.extract_strided_slice %276 {offsets = [0, 96], sizes = [2, 32], strides = [1, 1]} : vector<2x128xf32> to vector<2x32xf32>
    %284 = math.tanh %282 : vector<2x32xf32>
    %285 = arith.mulf %283, %284 : vector<2x32xf32>
    %286 = vector.extract_strided_slice %69 {offsets = [0, 0], sizes = [1, 16], strides = [1, 1]} : vector<2x32xf32> to vector<1x16xf32>
    %287 = vector.extract_strided_slice %105 {offsets = [0, 0], sizes = [1, 16], strides = [1, 1]} : vector<2x32xf32> to vector<1x16xf32>
    %288 = vector.extract_strided_slice %141 {offsets = [0, 0], sizes = [1, 16], strides = [1, 1]} : vector<2x32xf32> to vector<1x16xf32>
    %289 = vector.extract_strided_slice %177 {offsets = [0, 0], sizes = [1, 16], strides = [1, 1]} : vector<2x32xf32> to vector<1x16xf32>
    %290 = vector.extract_strided_slice %213 {offsets = [0, 0], sizes = [1, 16], strides = [1, 1]} : vector<2x32xf32> to vector<1x16xf32>
    %291 = vector.extract_strided_slice %249 {offsets = [0, 0], sizes = [1, 16], strides = [1, 1]} : vector<2x32xf32> to vector<1x16xf32>
    %292 = vector.extract_strided_slice %285 {offsets = [0, 0], sizes = [1, 16], strides = [1, 1]} : vector<2x32xf32> to vector<1x16xf32>
    %293 = vector.extract_strided_slice %69 {offsets = [1, 0], sizes = [1, 16], strides = [1, 1]} : vector<2x32xf32> to vector<1x16xf32>
    %294 = vector.extract_strided_slice %105 {offsets = [1, 0], sizes = [1, 16], strides = [1, 1]} : vector<2x32xf32> to vector<1x16xf32>
    %295 = vector.extract_strided_slice %141 {offsets = [1, 0], sizes = [1, 16], strides = [1, 1]} : vector<2x32xf32> to vector<1x16xf32>
    %296 = vector.extract_strided_slice %177 {offsets = [1, 0], sizes = [1, 16], strides = [1, 1]} : vector<2x32xf32> to vector<1x16xf32>
    %297 = vector.extract_strided_slice %213 {offsets = [1, 0], sizes = [1, 16], strides = [1, 1]} : vector<2x32xf32> to vector<1x16xf32>
    %298 = vector.extract_strided_slice %249 {offsets = [1, 0], sizes = [1, 16], strides = [1, 1]} : vector<2x32xf32> to vector<1x16xf32>
    %299 = vector.extract_strided_slice %285 {offsets = [1, 0], sizes = [1, 16], strides = [1, 1]} : vector<2x32xf32> to vector<1x16xf32>
    %300 = tpu.concatenate %286, %287, %288, %289, %290, %291, %292, %293, %294, %295, %296, %297, %298, %299 in 1 : vector<1x16xf32>, vector<1x16xf32>, vector<1x16xf32>, vector<1x16xf32>, vector<1x16xf32>, vector<1x16xf32>, vector<1x16xf32>, vector<1x16xf32>, vector<1x16xf32>, vector<1x16xf32>, vector<1x16xf32>, vector<1x16xf32>, vector<1x16xf32>, vector<1x16xf32> -> vector<1x224xf32>
    %301 = vector.extract_strided_slice %69 {offsets = [0, 16], sizes = [1, 16], strides = [1, 1]} : vector<2x32xf32> to vector<1x16xf32>
    %302 = vector.extract_strided_slice %105 {offsets = [0, 16], sizes = [1, 16], strides = [1, 1]} : vector<2x32xf32> to vector<1x16xf32>
    %303 = vector.extract_strided_slice %141 {offsets = [0, 16], sizes = [1, 16], strides = [1, 1]} : vector<2x32xf32> to vector<1x16xf32>
    %304 = vector.extract_strided_slice %177 {offsets = [0, 16], sizes = [1, 16], strides = [1, 1]} : vector<2x32xf32> to vector<1x16xf32>
    %305 = vector.extract_strided_slice %213 {offsets = [0, 16], sizes = [1, 16], strides = [1, 1]} : vector<2x32xf32> to vector<1x16xf32>
    %306 = vector.extract_strided_slice %249 {offsets = [0, 16], sizes = [1, 16], strides = [1, 1]} : vector<2x32xf32> to vector<1x16xf32>
    %307 = vector.extract_strided_slice %285 {offsets = [0, 16], sizes = [1, 16], strides = [1, 1]} : vector<2x32xf32> to vector<1x16xf32>
    %308 = vector.extract_strided_slice %69 {offsets = [1, 16], sizes = [1, 16], strides = [1, 1]} : vector<2x32xf32> to vector<1x16xf32>
    %309 = vector.extract_strided_slice %105 {offsets = [1, 16], sizes = [1, 16], strides = [1, 1]} : vector<2x32xf32> to vector<1x16xf32>
    %310 = vector.extract_strided_slice %141 {offsets = [1, 16], sizes = [1, 16], strides = [1, 1]} : vector<2x32xf32> to vector<1x16xf32>
    %311 = vector.extract_strided_slice %177 {offsets = [1, 16], sizes = [1, 16], strides = [1, 1]} : vector<2x32xf32> to vector<1x16xf32>
    %312 = vector.extract_strided_slice %213 {offsets = [1, 16], sizes = [1, 16], strides = [1, 1]} : vector<2x32xf32> to vector<1x16xf32>
    %313 = vector.extract_strided_slice %249 {offsets = [1, 16], sizes = [1, 16], strides = [1, 1]} : vector<2x32xf32> to vector<1x16xf32>
    %314 = vector.extract_strided_slice %285 {offsets = [1, 16], sizes = [1, 16], strides = [1, 1]} : vector<2x32xf32> to vector<1x16xf32>
    %315 = tpu.concatenate %301, %302, %303, %304, %305, %306, %307, %308, %309, %310, %311, %312, %313, %314 in 1 : vector<1x16xf32>, vector<1x16xf32>, vector<1x16xf32>, vector<1x16xf32>, vector<1x16xf32>, vector<1x16xf32>, vector<1x16xf32>, vector<1x16xf32>, vector<1x16xf32>, vector<1x16xf32>, vector<1x16xf32>, vector<1x16xf32>, vector<1x16xf32>, vector<1x16xf32> -> vector<1x224xf32>
    %316 = tpu.concatenate %300, %315 in 0 : vector<1x224xf32>, vector<1x224xf32> -> vector<2x224xf32>
    %c0_64 = arith.constant 0 : index
    %c0_65 = arith.constant 0 : index
    %317 = vector.load %arg5[%c0_64, %c0_65] : memref<224x32xf32, #tpu.memory_space<vmem>>, vector<224x32xf32>
    %cst_66 = arith.constant dense<0.000000e+00> : vector<2x32xf32>
    %318 = tpu.matmul %316, %317, %cst_66 {dimension_numbers = #tpu.dot_dimension_numbers<[1], [0], [0], [1], [0, 0, 1, 1], [], []>} : vector<2x224xf32>, vector<224x32xf32>, vector<2x32xf32> -> vector<2x32xf32>
    %c0_67 = arith.constant 0 : index
    %c0_68 = arith.constant 0 : index
    %319 = vector.load %arg7[%c0_67, %c0_68] : memref<2x32xf32, #tpu.memory_space<vmem>>, vector<1x32xf32>
    %320 = vector.broadcast %319 : vector<1x32xf32> to vector<2x32xf32>
    %321 = arith.addf %318, %320 : vector<2x32xf32>
    %c0_69 = arith.constant 0 : index
    %c0_70 = arith.constant 0 : index
    %322 = vector.load %arg6[%c0_69, %c0_70] : memref<32x1xf32, #tpu.memory_space<vmem>>, vector<32x1xf32>
    %cst_71 = arith.constant dense<0.000000e+00> : vector<2x1xf32>
    %323 = tpu.matmul %321, %322, %cst_71 {dimension_numbers = #tpu.dot_dimension_numbers<[1], [0], [0], [1], [0, 0, 1, 1], [], []>} : vector<2x32xf32>, vector<32x1xf32>, vector<2x1xf32> -> vector<2x1xf32>
    %c1_72 = arith.constant 1 : index
    %c0_73 = arith.constant 0 : index
    %324 = vector.load %arg7[%c1_72, %c0_73] : memref<2x32xf32, #tpu.memory_space<vmem>>, vector<1x1xf32>
    %325 = vector.broadcast %324 : vector<1x1xf32> to vector<2x1xf32>
    %326 = arith.addf %323, %325 : vector<2x1xf32>
    %c0_74 = arith.constant 0 : index
    %c0_75 = arith.constant 0 : index
    %327 = vector.load %arg8[%c0_74, %c0_75] : memref<2x1xf32, #tpu.memory_space<vmem>>, vector<2x1xf32>
    tpu.vector_store %arg8[%c0_74, %c0_75], %326 {strides = array<i32>} : memref<2x1xf32, #tpu.memory_space<vmem>>, vector<2x1xf32>,
    return
  }
}

</mosaic_0001>

<bundles_post_ra>
// kernel: dual_input_lstm_forward.1
= control target key start
LH: loop header
LB: loop body
LE: loop exit
PB: predicated region body
PF: predicated region fallthrough
CT: control target
= control target key end

     0   :  { %vm92_vm0 = vcmask 1046528   ;;  %v3334_v3 = vmov 0.0   ;;  %vm88_vm1 = vcmask 56320   ;;  %v58_v18 = vlaneseq  ;;  %s3336_s19 = smov 16   ;;  %s3337_s20 = smov 56   ;;  %s4447_s2 = inlined_call_operand.vmem [shape: f32[56,224], index: 2, kind: input, shape index: {}]   ;;  %s4448_s1 = inlined_call_operand.vmem [shape: f32[7,224], index: 1, kind: input, shape index: {}]   ;;  %s4449_s0 = inlined_call_operand.vmem [shape: f32[7,2,7], index: 0, kind: input, shape index: {}]   ;;  %s4450_s4 = inlined_call_operand.vmem [shape: f32[2,224], index: 4, kind: input, shape index: {}]   ;;  %s4451_s3 = inlined_call_operand.vmem [shape: f32[88,128], index: 3, kind: input, shape index: {}]   ;;  %s4452_s5 = inlined_call_operand.vmem [shape: f32[224,32], index: 5, kind: input, shape index: {}]   ;;  %s4453_s6 = inlined_call_operand.vmem [shape: f32[32,1], index: 6, kind: input, shape index: {}]   ;;  %s4454_s7 = inlined_call_operand.vmem [shape: f32[2,32], index: 7, kind: input, shape index: {}]   ;;  %s4455_s8 = inlined_call_operand.vmem [shape: f32[2,1], index: 8, kind: output, shape index: {}]  }
   0x1   :  { %v3394_v0 = vld [vmem:[%s4447_s2 + $0x68] sm:$0xff]  ;;  %v3399_v1 = vld [vmem:[%s4447_s2 + $0x60] sm:$0xff]  ;;  %v3404_v2 = vld [vmem:[%s4447_s2 + $0x58] sm:$0xff]  ;;  %163 = vmatprep.mubr.f32.mxu0 %v3334_v3  ;;  %238 = vmatprep.mubr.f32.mxu1 %v3334_v3  ;;  %v3335_v35 = vmov 0.5   ;;  %vm260_vm4 = vcmask 130048   ;;  %vm3338_vm5 = vmmov 0  }
   0x2   :  { %192 = vmatprep.subr.mxu1 %v3394_v0  ;;  %v3412_v4 = vld [vmem:[%s4447_s2 + $0x50] sm:$0xff]  ;;  %v3418_v5 = vld [vmem:[%s4447_s2 + $0x48] sm:$0xff]  ;;  %v3429_v7 = vld [vmem:[%s4447_s2 + $0x40] sm:$0xff]  ;;  %v79_v19 = vshrl.u32 %v58_v18, 7  ;;  %v3507_v33 = vand.u32 127, %v58_v18  ;;  %s3339_s21 = smov 112  }
   0x3   :  { %193 = vmatpush1.msra.mxu1 %v3399_v1  ;;  %v3423_v6 = vld [vmem:[%s4448_s1 + $0x8] sm:$0x7f]  ;;  %v3436_v8 = vld [vmem:[%s4448_s1] sm:$0x7f]  ;;  %v3442_v9 = vld [vmem:[%s4447_s2 + $0x38] sm:$0xff]  ;;  %s3340_s24 = smov 88  }
   0x4   :  { %194 = vmatprep.subr.mxu1 %v3404_v2  ;;  %2845 = vmatprep.subr.msk.mxu0 %vm92_vm0, %v3423_v6  ;;  %v76_v10 = vld [vmem:[%s4449_s0] sm:$0x3]  ;;  %v3453_v11 = vld [vmem:[%s4447_s2 + $0x30] sm:$0xff]  ;;  %v3460_v12 = vld [vmem:[%s4447_s2 + $0x28] sm:$0xff]  ;;  %v80_v20 = vsub.s32 0, %v79_v19  ;;  %v84_v23 = vsub.s32 1, %v79_v19 }
   0x5   :  { %195 = vmatpush1.msra.mxu1 %v3412_v4  ;;  %2846 = vmatpush1.msk.msra.mxu0 %vm92_vm0, %v3436_v8  ;;  %v3467_v13 = vld [vmem:[%s4447_s2 + $0x20] sm:$0xff]  ;;  %v3473_v14 = vld [vmem:[%s4447_s2 + $0x18] sm:$0xff]  ;;  %v3479_v15 = vld [vmem:[%s4447_s2 + $0x10] sm:$0xff]  ;;  %v60_v34 = vadd.s32 128, %v3507_v33  ;;  %vm61_vm2 = vcmp.ge.s32.totalorder %v3507_v33, 112  ;;  %vm170_vm6 = vcmask 457728  }
   0x6   :  { %196 = vmatprep.subr.mxu1 %v3418_v5  ;;  %2847 = vmatmul.mubr.msk.f32.vlgmr.msra.gmra.mxu0 %vm88_vm1, %v76_v10  ;;  %v3485_v16 = vld [vmem:[%s4447_s2 + $0x8] sm:$0xff]  ;;  %v3491_v17 = vld [vmem:[%s4447_s2] sm:$0xff]  ;;  %v3512_v36 = vsel %vm61_vm2, 1.0, %v3335_v35  ;;  %v3515_v38 = vsel %vm61_vm2, 0.0, %v3335_v35  ;;  %v3540_v53 = vld [vmem:[%s4451_s3 + $0x30] sm:$0xff]  ;;  %vm71_vm7 = vcmp.ge.s32.totalorder %v3507_v33, 64 }
   0x7   :  { %197 = vmatpush1.msra.mxu1 %v3429_v7  ;;  %2992 = vmatprep.subr.mxu0 %v3334_v3  ;;  %v56_v21 = vld [vmem:[%s4450_s4] ss:$2 sm:$0x3]  ;;  %vm64_vm3 = vcmp.lt.s32.totalorder %v60_v34, 168  ;;  %v3545_v54 = vld [vmem:[%s4451_s3 + $0x28] sm:$0xff]  ;;  %v3555_v55 = vld [vmem:[%s4451_s3 + $0x50] sm:$0xff] }
   0x8   :  { %198 = vmatprep.subr.mxu1 %v3442_v9  ;;  %v3501_v22 = vrot.slane %v56_v21, %v80_v20  ;;  %v3504_v26 = vrot.slane %v56_v21, %v84_v23  ;;  %v3518_v39 = vsel %vm64_vm3, 1.0, %v3335_v35  ;;  %v3524_v44 = vsel %vm64_vm3, 0.0, %v3335_v35  ;;  %3000 = vmatprep.mubr.msk.f32.mxu0 %vm3338_vm5, %v3334_v3  ;;  %v3560_v56 = vld [vmem:[%s4451_s3 + $0x48] sm:$0xff]  ;;  %v3566_v57 = vld [vmem:[%s4451_s3 + $0x20] sm:$0xff]  ;;  %v3580_v59 = vld [vmem:[%s4451_s3 + $0x18] sm:$0xff]  ;;  %s3341_s29 = smov 64  }
   0x9   :  { %199 = vmatpush1.msra.mxu1 %v3453_v11  ;;  %2993 = vmatpush3.msra.mxu0 %v3555_v55  ;;  %v3574_v58 = vld [vmem:[%s4451_s3 + $0x40] sm:$0xff]  ;;  %v3588_v60 = vld [vmem:[%s4451_s3 + $0x38] sm:$0xff]  ;;  %v3594_v61 = vld [vmem:[%s4451_s3 + $0x10] sm:$0xff]  ;;  %vm72_vm8 = vcmp.lt.s32.totalorder %v3507_v33, 96  ;;  %s3342_s30 = smov 32   ;;  %vm279_vm10 = vcmask 261120  }
   0xa   :  { %200 = vmatprep.subr.mxu1 %v3460_v12  ;;  %2994 = vmatprep.subr.mxu0 %v3334_v3  ;;  %v3603_v62 = vld [vmem:[%s4451_s3 + $0x8] sm:$0xff]  ;;  %v3613_v10 = vld [vmem:[%s4451_s3] sm:$0xff]  ;;  %vm73_vm9 = vmand %vm71_vm7, %vm72_vm8  ;;  %vm2577_vm11 = vcmask 392192   ;;  %vm2579_vm12 = vcmask 523264   ;;  %vm2581_vm13 = vcmask 654336   ;;  %vm2583_vm14 = vcmask 785408  }
   0xb   :  { %201 = vmatpush1.msra.mxu1 %v3467_v13  ;;  %2995 = vmatpush3.msra.mxu0 %v3560_v56  ;;  %vm2585_vm15 = vcmask 916480  }
   0xc   :  { %202 = vmatprep.subr.mxu1 %v3473_v14  ;;  %2996 = vmatprep.subr.mxu0 %v3334_v3 }
   0xd   :  { %203 = vmatpush1.msra.mxu1 %v3479_v15  ;;  %2997 = vmatpush3.msra.mxu0 %v3574_v58 }
   0xe   :  { %204 = vmatprep.subr.mxu1 %v3485_v16  ;;  %2998 = vmatprep.subr.mxu0 %v3334_v3 }
   0xf   :  { %205 = vmatpush1.msra.mxu1 %v3491_v17  ;;  %2999 = vmatpush3.msra.mxu0 %v3588_v60 }
  0x10   :  { %239 = vmatmul.mubr.f32.vlgmr.msra.gmra.mxu1 %v3334_v3  ;;  %3003 = vmatprep.subr.mxu1 %v3334_v3 }
  0x11   :  { %3017 = vmatprep.mubr.msk.f32.mxu1 %vm3338_vm5, %v3334_v3  ;;  %3004 = vmatpush3.msra.mxu1 %v3540_v53 }
  0x12   :  { %3005 = vmatprep.subr.mxu1 %v3334_v3  ;;  %3001 = vmatmul.mubr.f32.vlgmr.msra.gmra.mxu0 %v3334_v3 }
  0x13   :  { %3006 = vmatpush3.msra.mxu1 %v3545_v54  ;;  %3020 = vmatprep.subr.mxu0 %v3334_v3 }
  0x14   :  { %3007 = vmatprep.subr.mxu1 %v3334_v3  ;;  %3021 = vmatpush3.msra.mxu0 %v3555_v55 }
  0x15   :  { %3008 = vmatpush3.msra.mxu1 %v3566_v57  ;;  %3022 = vmatprep.subr.mxu0 %v3334_v3 }
  0x16   :  { %3009 = vmatprep.subr.mxu1 %v3334_v3  ;;  %3023 = vmatpush3.msra.mxu0 %v3560_v56 }
  0x17   :  { %3010 = vmatpush3.msra.mxu1 %v3580_v59  ;;  %3024 = vmatprep.subr.mxu0 %v3334_v3 }
  0x18   :  { %3011 = vmatprep.subr.mxu1 %v3334_v3  ;;  %3028 = vmatprep.mubr.msk.f32.mxu0 %vm3338_vm5, %v3334_v3 }
  0x19   :  { %3012 = vmatpush3.msra.mxu1 %v3594_v61  ;;  %3025 = vmatpush3.msra.mxu0 %v3574_v58 }
  0x1a   :  { %3013 = vmatprep.subr.mxu1 %v3334_v3  ;;  %3026 = vmatprep.subr.mxu0 %v3334_v3 }
  0x1b   :  { %3014 = vmatpush3.msra.mxu1 %v3603_v62  ;;  %3027 = vmatpush3.msra.mxu0 %v3588_v60 }
  0x1c   :  { %3015 = vmatprep.subr.mxu1 %v3334_v3  ;;  %3031 = vmatprep.subr.mxu0 %v3334_v3 }
  0x1d   :  { %3016 = vmatpush3.msra.mxu1 %v3613_v10 }
  0x1e   :  { %2851 = vmatprep.subr.msk.mxu1 %vm92_vm0, %v3423_v6 }
  0xc6   :  { %v165_v24 = vpop.f32.mrf.mxu0 }
  0xc7   :  { %v166_v25 = vadd.f32 %v165_v24, %v3501_v22  ;;  %v2850_v24 = vld [vmem:[%s4449_s0 + $0x2] sm:$0x3] }
  0xc8   :  { %v167_v27 = vpop.f32.mrf.mxu0 }
  0xc9   :  { %v168_v29 = vadd.f32 %v167_v27, %v3504_v26 }
  0xd0   :  { %v240_v28 = vpop.f32.mrf.mxu1 }
  0xd1   :  { %v245_v30 = vadd.f32 %v240_v28, %v166_v25  ;;  %v3666_v25 = vld [vmem:[%s4450_s4 + $0x1] ss:$0 sm:$0xff] }
  0xd2   :  { %v242_v31 = vpop.f32.mrf.mxu1  ;;  %v348_v20 = vpop.f32.mrf.mxu0 }
  0xd3   :  { %3236 = vtanh.f32 %v245_v30  ;;  %v246_v32 = vadd.f32 %v242_v31, %v168_v29  ;;  %v349_v27 = vadd.f32 %v3666_v25, %v348_v20 }
  0xd4   :  { %v3002_v21 = vpop.f32.mrf.mxu0 }
  0xd5   :  { %3238 = vtanh.f32 %v246_v32  ;;  %v3672_v32 = vsel %vm73_vm9, 1.0, %v3335_v35 }
  0xe0   :  { %v3237_v37 = vpop.eup %3236 }
  0xe1   :  { %v249_v40 = vmul.f32 %v3237_v37, %v3512_v36 }
  0xe2   :  { %v3239_v41 = vpop.eup %3238 }
  0xe3   :  { %v251_v42 = vadd.f32 %v249_v40, %v3515_v38  ;;  %v250_v43 = vmul.f32 %v3239_v41, %v3518_v39  ;;  %v3675_v40 = vsel %vm73_vm9, 0.0, %v3335_v35 }
  0xe5   :  { %256 = vrot.lane.b32.xlu0 %v251_v42, %s3336_s19  ;;  %v3528_v45 = vadd.f32 %v250_v43, %v3524_v44  ;;  %v253_v50 = vmul.f32 0.0, %v251_v42 }
  0xe9   :  { %258 = vrot.lane.b32.xlu0 %v3528_v45, %s3336_s19 }
 0x157   :  { %v257_v46 = vpop.permute.xlu0 %256 }
 0x15b   :  { %v259_v47 = vpop.permute.xlu0 %258 }
 0x15c   :  { %v261_v48 = vsel %vm260_vm4, %v257_v46, %v259_v47 }
 0x15d   :  { %v263_v49 = vmul.f32 %v261_v48, %v251_v42 }
 0x15f   :  { %265 = vrot.lane.b32.xlu1 %v263_v49, %s3337_s20 }
 0x1d1   :  { %v266_v51 = vpop.permute.xlu1 %265 }
 0x1d2   :  { %v3534_v52 = vadd.f32 %v266_v51, %v253_v50 }
 0x1d4   :  { %3240 = vtanh.f32 %v3534_v52 }
 0x1e1   :  { %v3241_v63 = vpop.eup %3240 }
 0x1e2   :  { %271 = vrot.lane.b32.xlu1 %v3241_v63, %s3339_s21 }
 0x254   :  { %v272_v18 = vpop.permute.xlu1 %271 }
 0x255   :  { %v274_v19 = vmul.f32 %v272_v18, %v3528_v45 }
 0x257   :  { %353 = vrot.lane.b32.xlu0 %v274_v19, %s3340_s24 }
 0x2c9   :  { %v354_v23 = vpop.permute.xlu0 %353 }
 0x2ca   :  { %3018 = vmatmul.mubr.msk.f32.vlgmr.msra.gmra.mxu1 %vm170_vm6, %v354_v23 }
 0x2cb   :  { %2852 = vmatpush1.msk.msra.mxu1 %vm92_vm0, %v3436_v8  ;;  %517 = vmatprep.mubr.f32.mxu1 %v3334_v3 }
 0x2cc   :  { %542 = vmatprep.subr.mxu1 %v3394_v0 }
 0x2ce   :  { %2853 = vmatmul.mubr.msk.f32.vlgmr.msra.gmra.mxu1 %vm88_vm1, %v2850_v24 }
 0x2cf   :  { %543 = vmatpush1.msra.mxu1 %v3399_v1  ;;  %588 = vmatprep.mubr.f32.mxu1 %v3334_v3 }
 0x2d0   :  { %544 = vmatprep.subr.mxu1 %v3404_v2 }
 0x2d1   :  { %545 = vmatpush1.msra.mxu1 %v3412_v4 }
 0x2d2   :  { %546 = vmatprep.subr.mxu1 %v3418_v5 }
 0x2d3   :  { %547 = vmatpush1.msra.mxu1 %v3429_v7 }
 0x2d4   :  { %548 = vmatprep.subr.mxu1 %v3442_v9 }
 0x2d5   :  { %549 = vmatpush1.msra.mxu1 %v3453_v11 }
 0x2d6   :  { %550 = vmatprep.subr.mxu1 %v3460_v12 }
 0x2d7   :  { %551 = vmatpush1.msra.mxu1 %v3467_v13 }
 0x2d8   :  { %552 = vmatprep.subr.mxu1 %v3473_v14 }
 0x2d9   :  { %553 = vmatpush1.msra.mxu1 %v3479_v15 }
 0x2da   :  { %554 = vmatprep.subr.mxu1 %v3485_v16 }
 0x2db   :  { %555 = vmatpush1.msra.mxu1 %v3491_v17 }
 0x2dc   :  { %2854 = vmatmul.mubr.msk.f32.vlgmr.msra.gmra.mxu1 %vm170_vm6, %v354_v23  ;;  %2858 = vmatprep.subr.msk.mxu1 %vm92_vm0, %v3423_v6 }
 0x2dd   :  { %2859 = vmatpush1.msk.msra.mxu1 %vm92_vm0, %v3436_v8  ;;  %864 = vmatprep.mubr.f32.mxu1 %v3334_v3 }
 0x2de   :  { %889 = vmatprep.subr.mxu1 %v3394_v0 }
 0x38a   :  { %v423_v28 = vpop.f32.mrf.mxu1 }
 0x38b   :  { %v427_v29 = vadd.f32 %v423_v28, %v349_v27 }
 0x38c   :  { %v3019_v30 = vpop.f32.mrf.mxu1 }
 0x38d   :  { %3242 = vtanh.f32 %v427_v29 }
 0x38e   :  { %v519_v31 = vpop.f32.mrf.mxu1 }
 0x38f   :  { %v520_v41 = vadd.f32 %v519_v31, %v3501_v22 }
 0x390   :  { %v521_v37 = vpop.f32.mrf.mxu1 }
 0x391   :  { %v522_v45 = vadd.f32 %v521_v37, %v3504_v26 }
 0x39a   :  { %v3243_v34 = vpop.eup %3242 }
 0x39b   :  { %v429_v42 = vmul.f32 %v3243_v34, %v3672_v32 }
 0x39c   :  { %v590_v43 = vpop.f32.mrf.mxu1 }
 0x39d   :  { %v595_v46 = vadd.f32 %v590_v43, %v520_v41  ;;  %v430_v33 = vadd.f32 %v429_v42, %v3675_v40  ;;  %v2857_v43 = vld [vmem:[%s4449_s0 + $0x4] sm:$0x3] }
 0x39e   :  { %v592_v47 = vpop.f32.mrf.mxu1  ;;  %2860 = vmatmul.mubr.msk.f32.vlgmr.msra.gmra.mxu1 %vm88_vm1, %v2857_v43 }
 0x39f   :  { %3244 = vtanh.f32 %v595_v46  ;;  %v596_v48 = vadd.f32 %v592_v47, %v522_v45  ;;  %433 = vrot.lane.b32.xlu1 %v430_v33, %s3341_s29  ;;  %v431_v28 = vmul.f32 0.0, %v430_v33  ;;  %890 = vmatpush1.msra.mxu1 %v3399_v1 }
 0x3a0   :  { %935 = vmatprep.mubr.f32.mxu1 %v3334_v3  ;;  %891 = vmatprep.subr.mxu1 %v3404_v2 }
 0x3a1   :  { %3246 = vtanh.f32 %v596_v48  ;;  %892 = vmatpush1.msra.mxu1 %v3412_v4 }
 0x3a2   :  { %893 = vmatprep.subr.mxu1 %v3418_v5 }
 0x3a3   :  { %894 = vmatpush1.msra.mxu1 %v3429_v7 }
 0x3a4   :  { %895 = vmatprep.subr.mxu1 %v3442_v9 }
 0x3a5   :  { %896 = vmatpush1.msra.mxu1 %v3453_v11 }
 0x3a6   :  { %897 = vmatprep.subr.mxu1 %v3460_v12 }
 0x3a7   :  { %898 = vmatpush1.msra.mxu1 %v3467_v13 }
 0x3a8   :  { %899 = vmatprep.subr.mxu1 %v3473_v14 }
 0x3a9   :  { %900 = vmatpush1.msra.mxu1 %v3479_v15 }
 0x3aa   :  { %901 = vmatprep.subr.mxu1 %v3485_v16 }
 0x3ab   :  { %902 = vmatpush1.msra.mxu1 %v3491_v17 }
 0x3ac   :  { %v3245_v49 = vpop.eup %3244  ;;  %3059 = vmatprep.subr.mxu1 %v3334_v3 }
 0x3ad   :  { %v599_v35 = vmul.f32 %v3245_v49, %v3512_v36 }
 0x3ae   :  { %v3247_v50 = vpop.eup %3246 }
 0x3af   :  { %v601_v51 = vadd.f32 %v599_v35, %v3515_v38  ;;  %v600_v63 = vmul.f32 %v3247_v50, %v3518_v39 }
 0x3b1   :  { %606 = vrot.lane.b32.xlu0 %v601_v51, %s3336_s19  ;;  %v602_v18 = vadd.f32 %v600_v63, %v3524_v44  ;;  %v603_v34 = vmul.f32 %v601_v51, %v3534_v52 }
 0x3b3   :  { %608 = vrot.lane.b32.xlu1 %v602_v18, %s3336_s19 }
 0x411   :  { %v434_v19 = vpop.permute.xlu1 %433 }
 0x412   :  { %v436_v20 = vmul.f32 %v434_v19, %v430_v33 }
 0x414   :  { %438 = vrot.lane.b32.xlu0 %v436_v20, %s3342_s30 }
 0x423   :  { %v607_v21 = vpop.permute.xlu0 %606 }
 0x425   :  { %v609_v23 = vpop.permute.xlu1 %608 }
 0x426   :  { %v610_v24 = vsel %vm260_vm4, %v607_v21, %v609_v23 }
 0x427   :  { %v612_v27 = vmul.f32 %v610_v24, %v601_v51 }
 0x429   :  { %614 = vrot.lane.b32.xlu1 %v612_v27, %s3337_s20 }
 0x45e   :  { %v866_v50 = vpop.f32.mrf.mxu1 }
 0x460   :  { %v868_v51 = vpop.f32.mrf.mxu1 }
 0x461   :  { %v869_v21 = vadd.f32 %v868_v51, %v3504_v26 }
 0x486   :  { %v439_v29 = vpop.permute.xlu0 %438 }
 0x487   :  { %v3691_v30 = vadd.f32 %v439_v29, %v431_v28 }
 0x489   :  { %3248 = vtanh.f32 %v3691_v30 }
 0x496   :  { %v3249_v31 = vpop.eup %3248 }
 0x497   :  { %444 = vrot.lane.b32.xlu0 %v3249_v31, %s3341_s29 }
 0x49b   :  { %v615_v37 = vpop.permute.xlu1 %614 }
 0x49c   :  { %v3696_v41 = vadd.f32 %v615_v37, %v603_v34 }
 0x49e   :  { %3250 = vtanh.f32 %v3696_v41 }
 0x4ab   :  { %v3251_v42 = vpop.eup %3250 }
 0x4ac   :  { %620 = vrot.lane.b32.xlu1 %v3251_v42, %s3339_s21 }
 0x509   :  { %v445_v52 = vpop.permute.xlu0 %444 }
 0x50a   :  { %v3713_v45 = vmul.f32 %v445_v52, %v430_v33 }
 0x50c   :  { %625 = vrot.lane.b32.xlu0 %v3713_v45, %s3342_s30 }
 0x51e   :  { %v621_v46 = vpop.permute.xlu1 %620 }
 0x51f   :  { %v623_v47 = vmul.f32 %v621_v46, %v602_v18  ;;  %v867_v18 = vadd.f32 %v866_v50, %v3501_v22 }
 0x521   :  { %700 = vrot.lane.b32.xlu1 %v623_v47, %s3340_s24 }
 0x57e   :  { %v3724_v33 = vpop.permute.xlu0 %625 }
 0x57f   :  { %3029 = vmatmul.mubr.msk.f32.vlgmr.msra.gmra.mxu0 %vm279_vm10, %v3724_v33 }
 0x580   :  { %3032 = vmatpush3.msra.mxu0 %v3540_v53  ;;  %3045 = vmatprep.mubr.msk.f32.mxu0 %vm3338_vm5, %v3334_v3 }
 0x581   :  { %3033 = vmatprep.subr.mxu0 %v3334_v3 }
 0x582   :  { %3034 = vmatpush3.msra.mxu0 %v3545_v54 }
 0x583   :  { %3035 = vmatprep.subr.mxu0 %v3334_v3 }
 0x584   :  { %3036 = vmatpush3.msra.mxu0 %v3566_v57 }
 0x585   :  { %3037 = vmatprep.subr.mxu0 %v3334_v3 }
 0x586   :  { %3038 = vmatpush3.msra.mxu0 %v3580_v59 }
 0x587   :  { %3039 = vmatprep.subr.mxu0 %v3334_v3 }
 0x588   :  { %3040 = vmatpush3.msra.mxu0 %v3594_v61 }
 0x589   :  { %3041 = vmatprep.subr.mxu0 %v3334_v3 }
 0x58a   :  { %3042 = vmatpush3.msra.mxu0 %v3603_v62 }
 0x58b   :  { %3043 = vmatprep.subr.mxu0 %v3334_v3 }
 0x58c   :  { %3044 = vmatpush3.msra.mxu0 %v3613_v10 }
 0x58d   :  { %3048 = vmatprep.subr.mxu0 %v3334_v3 }
 0x593   :  { %v701_v48 = vpop.permute.xlu1 %700 }
 0x594   :  { %3046 = vmatmul.mubr.msk.f32.vlgmr.msra.gmra.mxu0 %vm170_vm6, %v701_v48  ;;  %2861 = vmatmul.mubr.msk.f32.vlgmr.msra.gmra.mxu1 %vm170_vm6, %v701_v48 }
 0x595   :  { %3049 = vmatpush3.msra.mxu0 %v3555_v55  ;;  %3060 = vmatpush3.msra.mxu1 %v3540_v53 }
 0x596   :  { %3050 = vmatprep.subr.mxu0 %v3334_v3  ;;  %3061 = vmatprep.subr.mxu1 %v3334_v3 }
 0x597   :  { %3051 = vmatpush3.msra.mxu0 %v3560_v56  ;;  %3062 = vmatpush3.msra.mxu1 %v3545_v54 }
 0x598   :  { %3052 = vmatprep.subr.mxu0 %v3334_v3  ;;  %3063 = vmatprep.subr.mxu1 %v3334_v3 }
 0x599   :  { %3053 = vmatpush3.msra.mxu0 %v3574_v58  ;;  %3064 = vmatpush3.msra.mxu1 %v3566_v57 }
 0x59a   :  { %3054 = vmatprep.subr.mxu0 %v3334_v3  ;;  %3065 = vmatprep.subr.mxu1 %v3334_v3 }
 0x59b   :  { %3055 = vmatpush3.msra.mxu0 %v3588_v60  ;;  %3066 = vmatpush3.msra.mxu1 %v3580_v59 }
 0x59c   :  { %3056 = vmatprep.mubr.msk.f32.mxu0 %vm3338_vm5, %v3334_v3  ;;  %3067 = vmatprep.subr.mxu1 %v3334_v3 }
 0x59d   :  { %1236 = vmatprep.subr.mxu0 %v3394_v0  ;;  %3068 = vmatpush3.msra.mxu1 %v3594_v61 }
 0x59e   :  { %3069 = vmatprep.subr.mxu1 %v3334_v3  ;;  %3073 = vmatprep.mubr.msk.f32.mxu1 %vm3338_vm5, %v3334_v3 }
 0x59f   :  { %3070 = vmatpush3.msra.mxu1 %v3603_v62 }
 0x5a0   :  { %3071 = vmatprep.subr.mxu1 %v3334_v3 }
 0x5a1   :  { %3072 = vmatpush3.msra.mxu1 %v3613_v10 }
 0x5a2   :  { %2865 = vmatprep.subr.msk.mxu1 %vm92_vm0, %v3423_v6 }
 0x63f   :  { %v695_v49 = vpop.f32.mrf.mxu0 }
 0x640   :  { %v696_v63 = vadd.f32 %v3666_v25, %v695_v49 }
 0x641   :  { %v3030_v35 = vpop.f32.mrf.mxu0 }
 0x654   :  { %v770_v19 = vpop.f32.mrf.mxu0  ;;  %v937_v20 = vpop.f32.mrf.mxu1 }
 0x655   :  { %v774_v23 = vadd.f32 %v770_v19, %v696_v63  ;;  %v942_v24 = vadd.f32 %v937_v20, %v867_v18 }
 0x656   :  { %v3047_v27 = vpop.f32.mrf.mxu0  ;;  %v939_v28 = vpop.f32.mrf.mxu1 }
 0x657   :  { %3252 = vtanh.f32 %v774_v23  ;;  %v943_v29 = vadd.f32 %v939_v28, %v869_v21 }
 0x658   :  { %3254 = vtanh.f32 %v942_v24 }
 0x659   :  { %3256 = vtanh.f32 %v943_v29 }
 0x664   :  { %v3253_v31 = vpop.eup %3252 }
 0x665   :  { %v3255_v34 = vpop.eup %3254  ;;  %v776_v37 = vmul.f32 %v3253_v31, %v3672_v32 }
 0x666   :  { %v3257_v42 = vpop.eup %3256  ;;  %v946_v43 = vmul.f32 %v3255_v34, %v3512_v36 }
 0x667   :  { %v777_v52 = vadd.f32 %v776_v37, %v3675_v40  ;;  %v947_v46 = vmul.f32 %v3257_v42, %v3518_v39 }
 0x668   :  { %v948_v47 = vadd.f32 %v946_v43, %v3515_v38  ;;  %v2864_v43 = vld [vmem:[%s4449_s0 + $0x6] sm:$0x3] }
 0x669   :  { %780 = vrot.lane.b32.xlu0 %v777_v52, %s3341_s29  ;;  %v949_v48 = vadd.f32 %v947_v46, %v3524_v44  ;;  %v778_v19 = vmul.f32 %v777_v52, %v3691_v30 }
 0x66a   :  { %953 = vrot.lane.b32.xlu1 %v948_v47, %s3336_s19  ;;  %v950_v23 = vmul.f32 %v948_v47, %v3696_v41 }
 0x66d   :  { %955 = vrot.lane.b32.xlu0 %v949_v48, %s3336_s19 }
 0x6db   :  { %v781_v49 = vpop.permute.xlu0 %780 }
 0x6dc   :  { %v783_v35 = vmul.f32 %v781_v49, %v777_v52  ;;  %v954_v50 = vpop.permute.xlu1 %953 }
 0x6de   :  { %785 = vrot.lane.b32.xlu1 %v783_v35, %s3342_s30 }
 0x6df   :  { %v956_v51 = vpop.permute.xlu0 %955 }
 0x6e0   :  { %v957_v63 = vsel %vm260_vm4, %v954_v50, %v956_v51 }
 0x6e1   :  { %v959_v18 = vmul.f32 %v957_v63, %v948_v47 }
 0x6e3   :  { %961 = vrot.lane.b32.xlu0 %v959_v18, %s3337_s20 }
 0x750   :  { %v786_v20 = vpop.permute.xlu1 %785 }
 0x751   :  { %v3789_v21 = vadd.f32 %v786_v20, %v778_v19 }
 0x753   :  { %3258 = vtanh.f32 %v3789_v21 }
 0x755   :  { %v962_v24 = vpop.permute.xlu0 %961 }
 0x756   :  { %v3793_v27 = vadd.f32 %v962_v24, %v950_v23 }
 0x758   :  { %3260 = vtanh.f32 %v3793_v27 }
 0x760   :  { %v3259_v28 = vpop.eup %3258 }
 0x761   :  { %791 = vrot.lane.b32.xlu1 %v3259_v28, %s3341_s29 }
 0x765   :  { %v3261_v29 = vpop.eup %3260 }
 0x766   :  { %967 = vrot.lane.b32.xlu0 %v3261_v29, %s3339_s21 }
 0x7d3   :  { %v792_v31 = vpop.permute.xlu1 %791 }
 0x7d4   :  { %v3798_v30 = vmul.f32 %v792_v31, %v777_v52 }
 0x7d6   :  { %972 = vrot.lane.b32.xlu1 %v3798_v30, %s3342_s30 }
 0x7d8   :  { %v968_v34 = vpop.permute.xlu0 %967 }
 0x7d9   :  { %v970_v37 = vmul.f32 %v968_v34, %v949_v48 }
 0x7db   :  { %1047 = vrot.lane.b32.xlu0 %v970_v37, %s3340_s24 }
 0x848   :  { %v3803_v41 = vpop.permute.xlu1 %972 }
 0x849   :  { %3057 = vmatmul.mubr.msk.f32.vlgmr.msra.gmra.mxu0 %vm279_vm10, %v3803_v41 }
 0x84a   :  { %1237 = vmatpush1.msra.mxu0 %v3399_v1  ;;  %1282 = vmatprep.mubr.f32.mxu0 %v3334_v3 }
 0x84b   :  { %1238 = vmatprep.subr.mxu0 %v3404_v2 }
 0x84c   :  { %1239 = vmatpush1.msra.mxu0 %v3412_v4 }
 0x84d   :  { %1240 = vmatprep.subr.mxu0 %v3418_v5  ;;  %v1048_v42 = vpop.permute.xlu0 %1047 }
 0x84e   :  { %1241 = vmatpush1.msra.mxu0 %v3429_v7  ;;  %3074 = vmatmul.mubr.msk.f32.vlgmr.msra.gmra.mxu1 %vm170_vm6, %v1048_v42 }
 0x84f   :  { %1242 = vmatprep.subr.mxu0 %v3442_v9  ;;  %2866 = vmatpush1.msk.msra.mxu1 %vm92_vm0, %v3436_v8 }
 0x850   :  { %1243 = vmatpush1.msra.mxu0 %v3453_v11  ;;  %1211 = vmatprep.mubr.f32.mxu1 %v3334_v3 }
 0x851   :  { %1244 = vmatprep.subr.mxu0 %v3460_v12  ;;  %3076 = vmatprep.subr.mxu1 %v3334_v3 }
 0x852   :  { %1245 = vmatpush1.msra.mxu0 %v3467_v13  ;;  %2867 = vmatmul.mubr.msk.f32.vlgmr.msra.gmra.mxu1 %vm88_vm1, %v2864_v43 }
 0x853   :  { %1246 = vmatprep.subr.mxu0 %v3473_v14  ;;  %3077 = vmatpush3.msra.mxu1 %v3555_v55 }
 0x854   :  { %1247 = vmatpush1.msra.mxu0 %v3479_v15  ;;  %3078 = vmatprep.subr.mxu1 %v3334_v3 }
 0x855   :  { %1248 = vmatprep.subr.mxu0 %v3485_v16  ;;  %3079 = vmatpush3.msra.mxu1 %v3560_v56 }
 0x856   :  { %1249 = vmatpush1.msra.mxu0 %v3491_v17  ;;  %3080 = vmatprep.subr.mxu1 %v3334_v3 }
 0x857   :  { %2868 = vmatmul.mubr.msk.f32.vlgmr.msra.gmra.mxu0 %vm170_vm6, %v1048_v42  ;;  %3081 = vmatpush3.msra.mxu1 %v3574_v58 }
 0x858   :  { %3082 = vmatprep.subr.mxu1 %v3334_v3  ;;  %3087 = vmatprep.subr.mxu0 %v3334_v3 }
 0x859   :  { %3083 = vmatpush3.msra.mxu1 %v3588_v60  ;;  %3088 = vmatpush3.msra.mxu0 %v3540_v53 }
 0x85a   :  { %3084 = vmatprep.mubr.msk.f32.mxu1 %vm3338_vm5, %v3334_v3  ;;  %3089 = vmatprep.subr.mxu0 %v3334_v3 }
 0x85b   :  { %2872 = vmatprep.subr.msk.mxu1 %vm92_vm0, %v3423_v6  ;;  %3090 = vmatpush3.msra.mxu0 %v3545_v54 }
 0x85c   :  { %3091 = vmatprep.subr.mxu0 %v3334_v3  ;;  %3101 = vmatprep.mubr.msk.f32.mxu0 %vm3338_vm5, %v3334_v3 }
 0x85d   :  { %3092 = vmatpush3.msra.mxu0 %v3566_v57 }
 0x85e   :  { %3093 = vmatprep.subr.mxu0 %v3334_v3 }
 0x85f   :  { %3094 = vmatpush3.msra.mxu0 %v3580_v59 }
 0x860   :  { %3095 = vmatprep.subr.mxu0 %v3334_v3 }
 0x861   :  { %3096 = vmatpush3.msra.mxu0 %v3594_v61 }
 0x862   :  { %3097 = vmatprep.subr.mxu0 %v3334_v3 }
 0x863   :  { %3098 = vmatpush3.msra.mxu0 %v3603_v62 }
 0x864   :  { %3099 = vmatprep.subr.mxu0 %v3334_v3 }
 0x865   :  { %3100 = vmatpush3.msra.mxu0 %v3613_v10 }
 0x866   :  { %3104 = vmatprep.subr.mxu0 %v3334_v3 }
 0x909   :  { %v1042_v52 = vpop.f32.mrf.mxu0 }
 0x90a   :  { %v1043_v47 = vadd.f32 %v3666_v25, %v1042_v52 }
 0x90b   :  { %v3058_v46 = vpop.f32.mrf.mxu0 }
 0x90e   :  { %v1117_v48 = vpop.f32.mrf.mxu1 }
 0x90f   :  { %v1121_v49 = vadd.f32 %v1117_v48, %v1043_v47 }
 0x910   :  { %v3075_v35 = vpop.f32.mrf.mxu1 }
 0x911   :  { %3262 = vtanh.f32 %v1121_v49 }
 0x912   :  { %v1213_v50 = vpop.f32.mrf.mxu1 }
 0x913   :  { %v1214_v51 = vadd.f32 %v1213_v50, %v3501_v22 }
 0x914   :  { %v1215_v63 = vpop.f32.mrf.mxu1 }
 0x915   :  { %v1216_v18 = vadd.f32 %v1215_v63, %v3504_v26 }
 0x917   :  { %v1284_v19 = vpop.f32.mrf.mxu0 }
 0x918   :  { %v1289_v20 = vadd.f32 %v1284_v19, %v1214_v51 }
 0x919   :  { %v1286_v23 = vpop.f32.mrf.mxu0 }
 0x91a   :  { %3264 = vtanh.f32 %v1289_v20  ;;  %v1290_v24 = vadd.f32 %v1286_v23, %v1216_v18 }
 0x91c   :  { %3266 = vtanh.f32 %v1290_v24 }
 0x91e   :  { %v3263_v28 = vpop.eup %3262 }
 0x91f   :  { %v1123_v29 = vmul.f32 %v3263_v28, %v3672_v32 }
 0x921   :  { %v1124_v31 = vadd.f32 %v1123_v29, %v3675_v40 }
 0x923   :  { %1127 = vrot.lane.b32.xlu1 %v1124_v31, %s3341_s29  ;;  %v1125_v63 = vmul.f32 %v1124_v31, %v3789_v21 }
 0x927   :  { %v3265_v34 = vpop.eup %3264 }
 0x928   :  { %v1293_v37 = vmul.f32 %v3265_v34, %v3512_v36 }
 0x929   :  { %v3267_v42 = vpop.eup %3266 }
 0x92a   :  { %v1295_v43 = vadd.f32 %v1293_v37, %v3515_v38  ;;  %v1294_v52 = vmul.f32 %v3267_v42, %v3518_v39 }
 0x92c   :  { %1300 = vrot.lane.b32.xlu0 %v1295_v43, %s3336_s19  ;;  %v1296_v46 = vadd.f32 %v1294_v52, %v3524_v44  ;;  %v1297_v20 = vmul.f32 %v1295_v43, %v3793_v27 }
 0x92e   :  { %1302 = vrot.lane.b32.xlu1 %v1296_v46, %s3336_s19 }
 0x995   :  { %v1128_v47 = vpop.permute.xlu1 %1127 }
 0x996   :  { %v1130_v48 = vmul.f32 %v1128_v47, %v1124_v31 }
 0x998   :  { %1132 = vrot.lane.b32.xlu0 %v1130_v48, %s3342_s30 }
 0x99e   :  { %v1301_v49 = vpop.permute.xlu0 %1300 }
 0x9a0   :  { %v1303_v35 = vpop.permute.xlu1 %1302 }
 0x9a1   :  { %v1304_v50 = vsel %vm260_vm4, %v1301_v49, %v1303_v35 }
 0x9a2   :  { %v1306_v51 = vmul.f32 %v1304_v50, %v1295_v43 }
 0x9a4   :  { %1308 = vrot.lane.b32.xlu1 %v1306_v51, %s3337_s20 }
 0xa0a   :  { %v1133_v18 = vpop.permute.xlu0 %1132 }
 0xa0b   :  { %v3875_v19 = vadd.f32 %v1133_v18, %v1125_v63 }
 0xa0d   :  { %3268 = vtanh.f32 %v3875_v19 }
 0xa16   :  { %v1309_v23 = vpop.permute.xlu1 %1308 }
 0xa17   :  { %v3879_v24 = vadd.f32 %v1309_v23, %v1297_v20 }
 0xa19   :  { %3270 = vtanh.f32 %v3879_v24 }
 0xa1a   :  { %v3269_v28 = vpop.eup %3268 }
 0xa1b   :  { %1138 = vrot.lane.b32.xlu0 %v3269_v28, %s3341_s29 }
 0xa26   :  { %v3271_v29 = vpop.eup %3270 }
 0xa27   :  { %1314 = vrot.lane.b32.xlu1 %v3271_v29, %s3339_s21 }
 0xa8d   :  { %v1139_v34 = vpop.permute.xlu0 %1138 }
 0xa8e   :  { %v3884_v21 = vmul.f32 %v1139_v34, %v1124_v31  ;;  %v2871_v31 = vld [vmem:[%s4449_s0 + $0x8] sm:$0x3] }
 0xa90   :  { %1319 = vrot.lane.b32.xlu0 %v3884_v21, %s3342_s30 }
 0xa99   :  { %v1315_v37 = vpop.permute.xlu1 %1314 }
 0xa9a   :  { %v1317_v42 = vmul.f32 %v1315_v37, %v1296_v46 }
 0xa9c   :  { %1394 = vrot.lane.b32.xlu1 %v1317_v42, %s3340_s24 }
 0xb02   :  { %v1320_v27 = vpop.permute.xlu0 %1319 }
 0xb03   :  { %3085 = vmatmul.mubr.msk.f32.vlgmr.msra.gmra.mxu1 %vm279_vm10, %v1320_v27 }
 0xb04   :  { %2873 = vmatpush1.msk.msra.mxu1 %vm92_vm0, %v3436_v8  ;;  %1558 = vmatprep.mubr.f32.mxu1 %v3334_v3 }
 0xb05   :  { %1583 = vmatprep.subr.mxu1 %v3394_v0 }
 0xb07   :  { %2874 = vmatmul.mubr.msk.f32.vlgmr.msra.gmra.mxu1 %vm88_vm1, %v2871_v31 }
 0xb08   :  { %1584 = vmatpush1.msra.mxu1 %v3399_v1  ;;  %1629 = vmatprep.mubr.f32.mxu1 %v3334_v3 }
 0xb09   :  { %1585 = vmatprep.subr.mxu1 %v3404_v2 }
 0xb0a   :  { %1586 = vmatpush1.msra.mxu1 %v3412_v4 }
 0xb0b   :  { %1587 = vmatprep.subr.mxu1 %v3418_v5 }
 0xb0c   :  { %1588 = vmatpush1.msra.mxu1 %v3429_v7 }
 0xb0d   :  { %1589 = vmatprep.subr.mxu1 %v3442_v9 }
 0xb0e   :  { %1590 = vmatpush1.msra.mxu1 %v3453_v11  ;;  %v1395_v8 = vpop.permute.xlu1 %1394 }
 0xb0f   :  { %3102 = vmatmul.mubr.msk.f32.vlgmr.msra.gmra.mxu0 %vm170_vm6, %v1395_v8  ;;  %1591 = vmatprep.subr.mxu1 %v3460_v12 }
 0xb10   :  { %1592 = vmatpush1.msra.mxu1 %v3467_v13  ;;  %3105 = vmatpush3.msra.mxu0 %v3555_v55 }
 0xb11   :  { %1593 = vmatprep.subr.mxu1 %v3473_v14  ;;  %3106 = vmatprep.subr.mxu0 %v3334_v3 }
 0xb12   :  { %1594 = vmatpush1.msra.mxu1 %v3479_v15  ;;  %3107 = vmatpush3.msra.mxu0 %v3560_v56 }
 0xb13   :  { %1595 = vmatprep.subr.mxu1 %v3485_v16  ;;  %3108 = vmatprep.subr.mxu0 %v3334_v3 }
 0xb14   :  { %1596 = vmatpush1.msra.mxu1 %v3491_v17  ;;  %3109 = vmatpush3.msra.mxu0 %v3574_v58 }
 0xb15   :  { %2875 = vmatmul.mubr.msk.f32.vlgmr.msra.gmra.mxu1 %vm170_vm6, %v1395_v8  ;;  %3115 = vmatprep.subr.mxu1 %v3334_v3 }
 0xb16   :  { %3116 = vmatpush3.msra.mxu1 %v3540_v53  ;;  %3110 = vmatprep.subr.mxu0 %v3334_v3 }
 0xb17   :  { %3117 = vmatprep.subr.mxu1 %v3334_v3  ;;  %3111 = vmatpush3.msra.mxu0 %v3588_v60 }
 0xb18   :  { %3118 = vmatpush3.msra.mxu1 %v3545_v54  ;;  %3112 = vmatprep.mubr.msk.f32.mxu0 %vm3338_vm5, %v3334_v3 }
 0xb19   :  { %3119 = vmatprep.subr.mxu1 %v3334_v3  ;;  %2879 = vmatprep.subr.msk.mxu0 %vm92_vm0, %v3423_v6 }
 0xb1a   :  { %3120 = vmatpush3.msra.mxu1 %v3566_v57  ;;  %3129 = vmatprep.mubr.msk.f32.mxu1 %vm3338_vm5, %v3334_v3 }
 0xb1b   :  { %3121 = vmatprep.subr.mxu1 %v3334_v3 }
 0xb1c   :  { %3122 = vmatpush3.msra.mxu1 %v3580_v59 }
 0xb1d   :  { %3123 = vmatprep.subr.mxu1 %v3334_v3 }
 0xb1e   :  { %3124 = vmatpush3.msra.mxu1 %v3594_v61 }
 0xb1f   :  { %3125 = vmatprep.subr.mxu1 %v3334_v3 }
 0xb20   :  { %3126 = vmatpush3.msra.mxu1 %v3603_v62 }
 0xb21   :  { %3127 = vmatprep.subr.mxu1 %v3334_v3 }
 0xb22   :  { %3128 = vmatpush3.msra.mxu1 %v3613_v10 }
 0xb23   :  { %3132 = vmatprep.subr.mxu1 %v3334_v3 }
 0xbc3   :  { %v1389_v0 = vpop.f32.mrf.mxu1 }
 0xbc4   :  { %v1390_v2 = vadd.f32 %v3666_v25, %v1389_v0 }
 0xbc5   :  { %v3086_v1 = vpop.f32.mrf.mxu1 }
 0xbc7   :  { %v1560_v4 = vpop.f32.mrf.mxu1 }
 0xbc8   :  { %v1561_v11 = vadd.f32 %v1560_v4, %v3501_v22 }
 0xbc9   :  { %v1562_v9 = vpop.f32.mrf.mxu1 }
 0xbca   :  { %v1563_v13 = vadd.f32 %v1562_v9, %v3504_v26  ;;  %v3994_v9 = vld [vmem:[%s4447_s2 + $0x60] sm:$0xff] }
 0xbcf   :  { %v1464_v5 = vpop.f32.mrf.mxu0 }
 0xbd0   :  { %v1468_v6 = vadd.f32 %v1464_v5, %v1390_v2  ;;  %v3976_v5 = vld [vmem:[%s4448_s1] sm:$0x7f] }
 0xbd1   :  { %v3103_v7 = vpop.f32.mrf.mxu0 }
 0xbd2   :  { %3272 = vtanh.f32 %v1468_v6  ;;  %v2878_v6 = vld [vmem:[%s4449_s0 + $0xa] sm:$0x3] }
 0xbd3   :  { %v3987_v7 = vld [vmem:[%s4447_s2 + $0x68] sm:$0xff] }
 0xbd5   :  { %v1631_v12 = vpop.f32.mrf.mxu1 }
 0xbd6   :  { %v1636_v14 = vadd.f32 %v1631_v12, %v1561_v11  ;;  %v4001_v11 = vld [vmem:[%s4447_s2 + $0x58] sm:$0xff]  ;;  %v4007_v12 = vld [vmem:[%s4447_s2 + $0x50] sm:$0xff] }
 0xbd7   :  { %v1633_v15 = vpop.f32.mrf.mxu1 }
 0xbd8   :  { %3274 = vtanh.f32 %v1636_v14  ;;  %v1637_v16 = vadd.f32 %v1633_v15, %v1563_v13  ;;  %v4013_v13 = vld [vmem:[%s4447_s2 + $0x48] sm:$0xff]  ;;  %v4019_v15 = vld [vmem:[%s4447_s2 + $0x40] sm:$0xff] }
 0xbda   :  { %3276 = vtanh.f32 %v1637_v16  ;;  %v4026_v16 = vld [vmem:[%s4447_s2 + $0x38] sm:$0xff] }
 0xbdf   :  { %v3273_v17 = vpop.eup %3272 }
 0xbe0   :  { %v1470_v43 = vmul.f32 %v3273_v17, %v3672_v32  ;;  %v4033_v17 = vld [vmem:[%s4447_s2 + $0x30] sm:$0xff] }
 0xbe2   :  { %v1471_v52 = vadd.f32 %v1470_v43, %v3675_v40  ;;  %v4040_v43 = vld [vmem:[%s4447_s2 + $0x28] sm:$0xff] }
 0xbe4   :  { %1474 = vrot.lane.b32.xlu0 %v1471_v52, %s3341_s29  ;;  %v1472_v29 = vmul.f32 %v1471_v52, %v3875_v19 }
 0xbe5   :  { %v3275_v46 = vpop.eup %3274 }
 0xbe6   :  { %v1640_v47 = vmul.f32 %v3275_v46, %v3512_v36  ;;  %v4068_v46 = vld [vmem:[%s4447_s2 + $0x8] sm:$0xff] }
 0xbe7   :  { %v3277_v48 = vpop.eup %3276 }
 0xbe8   :  { %v1642_v49 = vadd.f32 %v1640_v47, %v3515_v38  ;;  %v1641_v35 = vmul.f32 %v3277_v48, %v3518_v39 }
 0xbea   :  { %1647 = vrot.lane.b32.xlu1 %v1642_v49, %s3336_s19  ;;  %v1643_v50 = vadd.f32 %v1641_v35, %v3524_v44  ;;  %v1644_v42 = vmul.f32 %v1642_v49, %v3879_v24 }
 0xbec   :  { %1649 = vrot.lane.b32.xlu0 %v1643_v50, %s3336_s19 }
 0xc56   :  { %v1475_v51 = vpop.permute.xlu0 %1474 }
 0xc57   :  { %v1477_v63 = vmul.f32 %v1475_v51, %v1471_v52 }
 0xc59   :  { %1479 = vrot.lane.b32.xlu1 %v1477_v63, %s3342_s30 }
 0xc5c   :  { %v1648_v18 = vpop.permute.xlu1 %1647 }
 0xc5e   :  { %v1650_v20 = vpop.permute.xlu0 %1649 }
 0xc5f   :  { %v1651_v23 = vsel %vm260_vm4, %v1648_v18, %v1650_v20 }
 0xc60   :  { %v1653_v28 = vmul.f32 %v1651_v23, %v1642_v49 }
 0xc62   :  { %1655 = vrot.lane.b32.xlu0 %v1653_v28, %s3337_s20 }
 0xccb   :  { %v1480_v34 = vpop.permute.xlu1 %1479 }
 0xccc   :  { %v3958_v37 = vadd.f32 %v1480_v34, %v1472_v29 }
 0xcce   :  { %3278 = vtanh.f32 %v3958_v37 }
 0xcd4   :  { %v1656_v27 = vpop.permute.xlu0 %1655 }
 0xcd5   :  { %v3962_v31 = vadd.f32 %v1656_v27, %v1644_v42 }
 0xcd7   :  { %3280 = vtanh.f32 %v3962_v31 }
 0xcdb   :  { %v3279_v8 = vpop.eup %3278 }
 0xcdc   :  { %1485 = vrot.lane.b32.xlu1 %v3279_v8, %s3341_s29 }
 0xce4   :  { %v3281_v0 = vpop.eup %3280 }
 0xce5   :  { %1661 = vrot.lane.b32.xlu0 %v3281_v0, %s3339_s21 }
 0xd4e   :  { %v1486_v1 = vpop.permute.xlu1 %1485 }
 0xd4f   :  { %v3967_v19 = vmul.f32 %v1486_v1, %v1471_v52  ;;  %v4054_v52 = vld [vmem:[%s4447_s2 + $0x18] sm:$0xff] }
 0xd51   :  { %1666 = vrot.lane.b32.xlu1 %v3967_v19, %s3342_s30 }
 0xd57   :  { %v1662_v2 = vpop.permute.xlu0 %1661 }
 0xd58   :  { %v1664_v4 = vmul.f32 %v1662_v2, %v1643_v50 }
 0xd5a   :  { %1741 = vrot.lane.b32.xlu0 %v1664_v4, %s3340_s24 }
 0xdc3   :  { %v1667_v24 = vpop.permute.xlu1 %1666 }
 0xdc4   :  { %3113 = vmatmul.mubr.msk.f32.vlgmr.msra.gmra.mxu0 %vm279_vm10, %v1667_v24 }
 0xdc5   :  { %2880 = vmatpush1.msk.msra.mxu0 %vm92_vm0, %v3976_v5  ;;  %1905 = vmatprep.mubr.f32.mxu0 %v3334_v3 }
 0xdc6   :  { %1930 = vmatprep.subr.mxu0 %v3987_v7 }
 0xdc8   :  { %2881 = vmatmul.mubr.msk.f32.vlgmr.msra.gmra.mxu0 %vm88_vm1, %v2878_v6 }
 0xdc9   :  { %1931 = vmatpush1.msra.mxu0 %v3994_v9  ;;  %1976 = vmatprep.mubr.f32.mxu0 %v3334_v3 }
 0xdca   :  { %1932 = vmatprep.subr.mxu0 %v4001_v11 }
 0xdcb   :  { %1933 = vmatpush1.msra.mxu0 %v4007_v12 }
 0xdcc   :  { %1934 = vmatprep.subr.mxu0 %v4013_v13  ;;  %v1742_v14 = vpop.permute.xlu0 %1741 }
 0xdcd   :  { %1935 = vmatpush1.msra.mxu0 %v4019_v15  ;;  %3130 = vmatmul.mubr.msk.f32.vlgmr.msra.gmra.mxu1 %vm170_vm6, %v1742_v14 }
 0xdce   :  { %1936 = vmatprep.subr.mxu0 %v4026_v16  ;;  %3133 = vmatpush3.msra.mxu1 %v3555_v55  ;;  %v4047_v55 = vld [vmem:[%s4447_s2 + $0x20] sm:$0xff] }
 0xdcf   :  { %1937 = vmatpush1.msra.mxu0 %v4033_v17  ;;  %3134 = vmatprep.subr.mxu1 %v3334_v3 }
 0xdd0   :  { %1938 = vmatprep.subr.mxu0 %v4040_v43  ;;  %3135 = vmatpush3.msra.mxu1 %v3560_v56  ;;  %v4061_v56 = vld [vmem:[%s4447_s2 + $0x10] sm:$0xff] }
 0xdd1   :  { %1939 = vmatpush1.msra.mxu0 %v4047_v55  ;;  %3136 = vmatprep.subr.mxu1 %v3334_v3 }
 0xdd2   :  { %1940 = vmatprep.subr.mxu0 %v4054_v52  ;;  %3137 = vmatpush3.msra.mxu1 %v3574_v58  ;;  %v4075_v58 = vld [vmem:[%s4447_s2] sm:$0xff] }
 0xdd3   :  { %1941 = vmatpush1.msra.mxu0 %v4061_v56  ;;  %3138 = vmatprep.subr.mxu1 %v3334_v3 }
 0xdd4   :  { %1942 = vmatprep.subr.mxu0 %v4068_v46  ;;  %3139 = vmatpush3.msra.mxu1 %v3588_v60  ;;  %v3321_v60 = vld [vmem:[%s4448_s1 + $0x8] sm:$0x7f] }
 0xdd5   :  { %1943 = vmatpush1.msra.mxu0 %v4075_v58  ;;  %3140 = vmatprep.mubr.msk.f32.mxu1 %vm3338_vm5, %v3334_v3 }
 0xdd6   :  { %2882 = vmatmul.mubr.msk.f32.vlgmr.msra.gmra.mxu0 %vm170_vm6, %v1742_v14  ;;  %3143 = vmatprep.subr.mxu0 %v3334_v3 }
 0xdd7   :  { %3144 = vmatpush3.msra.mxu0 %v3540_v53  ;;  %2886 = vmatprep.subr.msk.mxu1 %vm92_vm0, %v3321_v60 }
 0xdd8   :  { %3145 = vmatprep.subr.mxu0 %v3334_v3  ;;  %3157 = vmatprep.mubr.msk.f32.mxu0 %vm3338_vm5, %v3334_v3 }
 0xdd9   :  { %3146 = vmatpush3.msra.mxu0 %v3545_v54 }
 0xdda   :  { %3147 = vmatprep.subr.mxu0 %v3334_v3 }
 0xddb   :  { %3148 = vmatpush3.msra.mxu0 %v3566_v57 }
 0xddc   :  { %3149 = vmatprep.subr.mxu0 %v3334_v3 }
 0xddd   :  { %3150 = vmatpush3.msra.mxu0 %v3580_v59 }
 0xdde   :  { %3151 = vmatprep.subr.mxu0 %v3334_v3 }
 0xddf   :  { %3152 = vmatpush3.msra.mxu0 %v3594_v61 }
 0xde0   :  { %3153 = vmatprep.subr.mxu0 %v3334_v3 }
 0xde1   :  { %3154 = vmatpush3.msra.mxu0 %v3603_v62 }
 0xde2   :  { %3155 = vmatprep.subr.mxu0 %v3334_v3 }
 0xde3   :  { %3156 = vmatpush3.msra.mxu0 %v3613_v10 }
 0xde4   :  { %3160 = vmatprep.subr.mxu0 %v3334_v3 }
 0xe84   :  { %v1736_v53 = vpop.f32.mrf.mxu0 }
 0xe85   :  { %v1737_v57 = vadd.f32 %v3666_v25, %v1736_v53 }
 0xe86   :  { %v3114_v54 = vpop.f32.mrf.mxu0 }
 0xe88   :  { %v1907_v49 = vpop.f32.mrf.mxu0 }
 0xe89   :  { %v1908_v35 = vadd.f32 %v1907_v49, %v3501_v22 }
 0xe8a   :  { %v1909_v61 = vpop.f32.mrf.mxu0 }
 0xe8b   :  { %v1910_v62 = vadd.f32 %v1909_v61, %v3504_v26 }
 0xe8d   :  { %v1811_v47 = vpop.f32.mrf.mxu1 }
 0xe8e   :  { %v1815_v59 = vadd.f32 %v1811_v47, %v1737_v57 }
 0xe8f   :  { %v3131_v48 = vpop.f32.mrf.mxu1 }
 0xe90   :  { %3282 = vtanh.f32 %v1815_v59 }
 0xe96   :  { %v1978_v50 = vpop.f32.mrf.mxu0 }
 0xe97   :  { %v1983_v51 = vadd.f32 %v1978_v50, %v1908_v35  ;;  %v2885_v35 = vld [vmem:[%s4449_s0 + $0xc] sm:$0x3] }
 0xe98   :  { %v1980_v63 = vpop.f32.mrf.mxu0 }
 0xe99   :  { %3284 = vtanh.f32 %v1983_v51  ;;  %v1984_v10 = vadd.f32 %v1980_v63, %v1910_v62 }
 0xe9b   :  { %3286 = vtanh.f32 %v1984_v10 }
 0xe9d   :  { %v3283_v18 = vpop.eup %3282 }
 0xe9e   :  { %v1817_v20 = vmul.f32 %v3283_v18, %v3672_v32 }
 0xea0   :  { %v1818_v25 = vadd.f32 %v1817_v20, %v3675_v40 }
 0xea2   :  { %1821 = vrot.lane.b32.xlu1 %v1818_v25, %s3341_s29  ;;  %v1819_v6 = vmul.f32 %v1818_v25, %v3958_v37 }
 0xea6   :  { %v3285_v23 = vpop.eup %3284 }
 0xea7   :  { %v1987_v28 = vmul.f32 %v3285_v23, %v3512_v36 }
 0xea8   :  { %v3287_v29 = vpop.eup %3286 }
 0xea9   :  { %v1989_v34 = vadd.f32 %v1987_v28, %v3515_v38  ;;  %v1988_v42 = vmul.f32 %v3287_v29, %v3518_v39 }
 0xeab   :  { %1994 = vrot.lane.b32.xlu0 %v1989_v34, %s3336_s19  ;;  %v1990_v27 = vadd.f32 %v1988_v42, %v3524_v44  ;;  %v1991_v53 = vmul.f32 %v1989_v34, %v3962_v31 }
 0xead   :  { %1996 = vrot.lane.b32.xlu1 %v1990_v27, %s3336_s19 }
 0xf14   :  { %v1822_v8 = vpop.permute.xlu1 %1821 }
 0xf15   :  { %v1824_v0 = vmul.f32 %v1822_v8, %v1818_v25 }
 0xf17   :  { %1826 = vrot.lane.b32.xlu0 %v1824_v0, %s3342_s30 }
 0xf1d   :  { %v1995_v1 = vpop.permute.xlu0 %1994 }
 0xf1f   :  { %v1997_v2 = vpop.permute.xlu1 %1996 }
 0xf20   :  { %v1998_v4 = vsel %vm260_vm4, %v1995_v1, %v1997_v2 }
 0xf21   :  { %v2000_v24 = vmul.f32 %v1998_v4, %v1989_v34 }
 0xf23   :  { %2002 = vrot.lane.b32.xlu1 %v2000_v24, %s3337_s20 }
 0xf89   :  { %v1827_v14 = vpop.permute.xlu0 %1826 }
 0xf8a   :  { %v4118_v60 = vadd.f32 %v1827_v14, %v1819_v6 }
 0xf8c   :  { %3288 = vtanh.f32 %v4118_v60 }
 0xf95   :  { %v2003_v54 = vpop.permute.xlu1 %2002 }
 0xf96   :  { %v4122_v57 = vadd.f32 %v2003_v54, %v1991_v53 }
 0xf98   :  { %3290 = vtanh.f32 %v4122_v57 }
 0xf99   :  { %v3289_v47 = vpop.eup %3288 }
 0xf9a   :  { %1832 = vrot.lane.b32.xlu0 %v3289_v47, %s3341_s29 }
 0xfa5   :  { %v3291_v59 = vpop.eup %3290 }
 0xfa6   :  { %2008 = vrot.lane.b32.xlu1 %v3291_v59, %s3339_s21 }
0x100c   :  { %v1833_v48 = vpop.permute.xlu0 %1832 }
0x100d   :  { %v4127_v37 = vmul.f32 %v1833_v48, %v1818_v25 }
0x100f   :  { %2013 = vrot.lane.b32.xlu0 %v4127_v37, %s3342_s30 }
0x1018   :  { %v2009_v49 = vpop.permute.xlu1 %2008 }
0x1019   :  { %v2011_v61 = vmul.f32 %v2009_v49, %v1990_v27 }
0x101b   :  { %2088 = vrot.lane.b32.xlu1 %v2011_v61, %s3340_s24 }
0x1081   :  { %v2014_v31 = vpop.permute.xlu0 %2013 }
0x1082   :  { %3141 = vmatmul.mubr.msk.f32.vlgmr.msra.gmra.mxu1 %vm279_vm10, %v2014_v31 }
0x1083   :  { %2887 = vmatpush1.msk.msra.mxu1 %vm92_vm0, %v3976_v5  ;;  %2252 = vmatprep.mubr.f32.mxu1 %v3334_v3  ;;  %vm2648_vm0 = vcmask 1040384  }
0x1084   :  { %2277 = vmatprep.subr.mxu1 %v3987_v7  ;;  %v3322_v7 = vld [vmem:[%s4451_s3 + $0x50] sm:$0xff] }
0x1086   :  { %2888 = vmatmul.mubr.msk.f32.vlgmr.msra.gmra.mxu1 %vm88_vm1, %v2885_v35  ;;  %vm2839_vm1 = vcmask 1024  }
0x1087   :  { %2278 = vmatpush1.msra.mxu1 %v3994_v9  ;;  %2323 = vmatprep.mubr.f32.mxu1 %v3334_v3  ;;  %v3323_v9 = vld [vmem:[%s4451_s3 + $0x48] sm:$0xff] }
0x1088   :  { %2279 = vmatprep.subr.mxu1 %v4001_v11  ;;  %v3324_v11 = vld [vmem:[%s4451_s3 + $0x40] sm:$0xff] }
0x1089   :  { %2280 = vmatpush1.msra.mxu1 %v4007_v12  ;;  %v3325_v12 = vld [vmem:[%s4451_s3 + $0x30] sm:$0xff] }
0x108a   :  { %2281 = vmatprep.subr.mxu1 %v4013_v13  ;;  %v3326_v13 = vld [vmem:[%s4451_s3 + $0x38] sm:$0xff] }
0x108b   :  { %2282 = vmatpush1.msra.mxu1 %v4019_v15  ;;  %v3327_v15 = vld [vmem:[%s4451_s3 + $0x28] sm:$0xff] }
0x108c   :  { %2283 = vmatprep.subr.mxu1 %v4026_v16  ;;  %v3328_v16 = vld [vmem:[%s4451_s3 + $0x20] sm:$0xff] }
0x108d   :  { %2284 = vmatpush1.msra.mxu1 %v4033_v17  ;;  %v2089_v5 = vpop.permute.xlu1 %2088  ;;  %v3329_v17 = vld [vmem:[%s4451_s3 + $0x18] sm:$0xff] }
0x108e   :  { %3158 = vmatmul.mubr.msk.f32.vlgmr.msra.gmra.mxu0 %vm170_vm6, %v2089_v5  ;;  %2285 = vmatprep.subr.mxu1 %v4040_v43  ;;  %v3330_v43 = vld [vmem:[%s4451_s3 + $0x10] sm:$0xff] }
0x108f   :  { %2286 = vmatpush1.msra.mxu1 %v4047_v55  ;;  %3161 = vmatpush3.msra.mxu0 %v3322_v7  ;;  %v3331_v55 = vld [vmem:[%s4451_s3 + $0x8] sm:$0xff] }
0x1090   :  { %2287 = vmatprep.subr.mxu1 %v4054_v52  ;;  %3162 = vmatprep.subr.mxu0 %v3334_v3  ;;  %v3332_v52 = vld [vmem:[%s4451_s3] sm:$0xff]  ;;  %s3343_s3 = smov 80  }
0x1091   :  { %2288 = vmatpush1.msra.mxu1 %v4061_v56  ;;  %3163 = vmatpush3.msra.mxu0 %v3323_v9 }
0x1092   :  { %2289 = vmatprep.subr.mxu1 %v4068_v46  ;;  %3164 = vmatprep.subr.mxu0 %v3334_v3 }
0x1093   :  { %2290 = vmatpush1.msra.mxu1 %v4075_v58  ;;  %3165 = vmatpush3.msra.mxu0 %v3324_v11  ;;  %v3333_v58 = vld [vmem:[%s4450_s4 + $0x1] ss:$0 sm:$0xff]  ;;  %s3344_s4 = smov 96  }
0x1094   :  { %2889 = vmatmul.mubr.msk.f32.vlgmr.msra.gmra.mxu1 %vm170_vm6, %v2089_v5  ;;  %3171 = vmatprep.subr.mxu1 %v3334_v3 }
0x1095   :  { %3172 = vmatpush3.msra.mxu1 %v3325_v12  ;;  %3166 = vmatprep.subr.mxu0 %v3334_v3 }
0x1096   :  { %3173 = vmatprep.subr.mxu1 %v3334_v3  ;;  %3167 = vmatpush3.msra.mxu0 %v3326_v13 }
0x1097   :  { %3174 = vmatpush3.msra.mxu1 %v3327_v15  ;;  %3168 = vmatprep.mubr.msk.f32.mxu0 %vm3338_vm5, %v3334_v3 }
0x1098   :  { %3175 = vmatprep.subr.mxu1 %v3334_v3  ;;  %3185 = vmatprep.mubr.msk.f32.mxu1 %vm3338_vm5, %v3334_v3 }
0x1099   :  { %3176 = vmatpush3.msra.mxu1 %v3328_v16  ;;  %2687 = vmatprep.subr.mxu0 %v3334_v3 }
0x109a   :  { %3177 = vmatprep.subr.mxu1 %v3334_v3 }
0x109b   :  { %3178 = vmatpush3.msra.mxu1 %v3329_v17 }
0x109c   :  { %3179 = vmatprep.subr.mxu1 %v3334_v3 }
0x109d   :  { %3180 = vmatpush3.msra.mxu1 %v3330_v43 }
0x109e   :  { %3181 = vmatprep.subr.mxu1 %v3334_v3 }
0x109f   :  { %3182 = vmatpush3.msra.mxu1 %v3331_v55 }
0x10a0   :  { %3183 = vmatprep.subr.mxu1 %v3334_v3 }
0x10a1   :  { %3184 = vmatpush3.msra.mxu1 %v3332_v52 }
0x10a2   :  { %3188 = vmatprep.subr.mxu1 %v3334_v3 }
0x1142   :  { %v2083_v56 = vpop.f32.mrf.mxu1 }
0x1143   :  { %v2084_v50 = vadd.f32 %v3333_v58, %v2083_v56 }
0x1144   :  { %v3142_v46 = vpop.f32.mrf.mxu1 }
0x1145   :  { %v2550_v46 = vrot.slane %v3798_v30, 1 }
0x1146   :  { %v2254_v62 = vpop.f32.mrf.mxu1 }
0x1147   :  { %v2255_v20 = vadd.f32 %v2254_v62, %v3501_v22 }
0x1148   :  { %v2256_v18 = vpop.f32.mrf.mxu1 }
0x1149   :  { %v2257_v23 = vadd.f32 %v2256_v18, %v3504_v26  ;;  %v2554_v18 = vrot.slane %v3884_v21, 1 }
0x114e   :  { %v2158_v51 = vpop.f32.mrf.mxu0 }
0x114f   :  { %v2162_v63 = vadd.f32 %v2158_v51, %v2084_v50 }
0x1150   :  { %v3159_v10 = vpop.f32.mrf.mxu0 }
0x1151   :  { %3292 = vtanh.f32 %v2162_v63 }
0x1154   :  { %v2325_v25 = vpop.f32.mrf.mxu1 }
0x1155   :  { %v2330_v28 = vadd.f32 %v2325_v25, %v2255_v20  ;;  %v2666_v20 = vld [vmem:[%s4452_s5 + $0x78] sm:$0xff]  ;;  %v2665_v25 = vld [vmem:[%s4452_s5 + $0x70] sm:$0xff] }
0x1156   :  { %v2327_v29 = vpop.f32.mrf.mxu1 }
0x1157   :  { %3294 = vtanh.f32 %v2330_v28  ;;  %v2331_v34 = vadd.f32 %v2327_v29, %v2257_v23  ;;  %v2562_v23 = vrot.slane %v4127_v37, 1  ;;  %v2662_v29 = vld [vmem:[%s4452_s5 + $0x58] sm:$0xff] }
0x1159   :  { %3296 = vtanh.f32 %v2331_v34  ;;  %v2661_v34 = vld [vmem:[%s4452_s5 + $0x50] sm:$0xff] }
0x115e   :  { %v3293_v42 = vpop.eup %3292 }
0x115f   :  { %v2164_v27 = vmul.f32 %v3293_v42, %v3672_v32  ;;  %v2659_v42 = vld [vmem:[%s4452_s5 + $0x40] sm:$0xff] }
0x1161   :  { %v2165_v8 = vadd.f32 %v2164_v27, %v3675_v40  ;;  %v2658_v27 = vld [vmem:[%s4452_s5 + $0x38] sm:$0xff] }
0x1163   :  { %2168 = vrot.lane.b32.xlu0 %v2165_v8, %s3341_s29 }
0x1164   :  { %v3295_v0 = vpop.eup %3294 }
0x1165   :  { %v2334_v1 = vmul.f32 %v3295_v0, %v3512_v36  ;;  %v2656_v0 = vld [vmem:[%s4452_s5 + $0x28] sm:$0xff] }
0x1166   :  { %v3297_v2 = vpop.eup %3296 }
0x1167   :  { %v2336_v22 = vadd.f32 %v2334_v1, %v3515_v38  ;;  %v2335_v26 = vmul.f32 %v3297_v2, %v3518_v39  ;;  %v2166_v38 = vmul.f32 %v2165_v8, %v4118_v60  ;;  %v2655_v1 = vld [vmem:[%s4452_s5 + $0x20] sm:$0xff]  ;;  %v2654_v2 = vld [vmem:[%s4452_s5 + $0x18] sm:$0xff] }
0x1169   :  { %2341 = vrot.lane.b32.xlu1 %v2336_v22, %s3336_s19  ;;  %v2337_v4 = vadd.f32 %v2335_v26, %v3524_v44  ;;  %v2338_v44 = vmul.f32 %v2336_v22, %v4122_v57  ;;  %v2652_v26 = vld [vmem:[%s4452_s5 + $0x8] sm:$0xff] }
0x116b   :  { %2343 = vrot.lane.b32.xlu0 %v2337_v4, %s3336_s19 }
0x11d5   :  { %v2169_v24 = vpop.permute.xlu0 %2168 }
0x11d6   :  { %v2171_v6 = vmul.f32 %v2169_v24, %v2165_v8  ;;  %v2678_v24 = vld [vmem:[%s4452_s5 + $0xd8] sm:$0xff] }
0x11d8   :  { %2173 = vrot.lane.b32.xlu1 %v2171_v6, %s3342_s30  ;;  %v2677_v6 = vld [vmem:[%s4452_s5 + $0xd0] sm:$0xff] }
0x11db   :  { %v2342_v14 = vpop.permute.xlu1 %2341 }
0x11dd   :  { %v2344_v53 = vpop.permute.xlu0 %2343 }
0x11de   :  { %v2345_v54 = vsel %vm260_vm4, %v2342_v14, %v2344_v53  ;;  %v2676_v14 = vld [vmem:[%s4452_s5 + $0xc8] sm:$0xff]  ;;  %v2675_v53 = vld [vmem:[%s4452_s5 + $0xc0] sm:$0xff] }
0x11df   :  { %v2347_v36 = vmul.f32 %v2345_v54, %v2336_v22  ;;  %v2653_v22 = vld [vmem:[%s4452_s5 + $0x10] sm:$0xff]  ;;  %v2674_v54 = vld [vmem:[%s4452_s5 + $0xb8] sm:$0xff] }
0x11e1   :  { %2349 = vrot.lane.b32.xlu0 %v2347_v36, %s3337_s20  ;;  %s3345_s20 = smov 48   ;;  %v2673_v36 = vld [vmem:[%s4452_s5 + $0xb0] sm:$0xff] }
0x124a   :  { %v2174_v39 = vpop.permute.xlu1 %2173 }
0x124b   :  { %v2176_v47 = vadd.f32 %v2174_v39, %v2166_v38  ;;  %v2672_v38 = vld [vmem:[%s4452_s5 + $0xa8] sm:$0xff]  ;;  %v2671_v39 = vld [vmem:[%s4452_s5 + $0xa0] sm:$0xff] }
0x124d   :  { %3298 = vtanh.f32 %v2176_v47 }
0x1253   :  { %v2350_v59 = vpop.permute.xlu0 %2349 }
0x1254   :  { %v2352_v48 = vadd.f32 %v2350_v59, %v2338_v44  ;;  %v2669_v44 = vld [vmem:[%s4452_s5 + $0x90] sm:$0xff]  ;;  %v2668_v59 = vld [vmem:[%s4452_s5 + $0x88] sm:$0xff] }
0x1256   :  { %3300 = vtanh.f32 %v2352_v48  ;;  %v2667_v48 = vld [vmem:[%s4452_s5 + $0x80] sm:$0xff] }
0x125a   :  { %v3299_v49 = vpop.eup %3298 }
0x125b   :  { %2179 = vrot.lane.b32.xlu1 %v3299_v49, %s3341_s29 }
0x1263   :  { %v3301_v61 = vpop.eup %3300 }
0x1264   :  { %2355 = vrot.lane.b32.xlu0 %v3301_v61, %s3339_s21  ;;  %v2760_v61 = vld [vmem:[%s4453_s6 + $0x18] sm:$0xff] }
0x12cd   :  { %v2180_v31 = vpop.permute.xlu1 %2179 }
0x12ce   :  { %v4227_v35 = vmul.f32 %v2180_v31, %v2165_v8  ;;  %v2657_v8 = vld [vmem:[%s4452_s5 + $0x30] sm:$0xff] }
0x12cf   :  { %v2759_v31 = vld [vmem:[%s4453_s6 + $0x10] sm:$0xff] }
0x12d0   :  { %2360 = vrot.lane.b32.xlu1 %v4227_v35, %s3342_s30  ;;  %v2566_v50 = vrot.slane %v4227_v35, 1  ;;  %v3226_v28 = vpack.i.bf16 %v4127_v37, %v4227_v35 }
0x12d6   :  { %v2356_v60 = vpop.permute.xlu0 %2355 }
0x12d7   :  { %v2358_v5 = vmul.f32 %v2356_v60, %v2337_v4  ;;  %v2651_v4 = vld [vmem:[%s4452_s5] sm:$0xff] }
0x12d9   :  { %2435 = vrot.lane.b32.xlu0 %v2358_v5, %s3340_s24 }
0x1342   :  { %v2361_v57 = vpop.permute.xlu1 %2360 }
0x1343   :  { %3169 = vmatmul.mubr.msk.f32.vlgmr.msra.gmra.mxu0 %vm279_vm10, %v2361_v57 }
0x1344   :  { %2688 = vmatpush1.msra.mxu0 %v2666_v20 }
0x1345   :  { %2689 = vmatprep.subr.mxu0 %v3334_v3 }
0x1346   :  { %2690 = vmatpush1.msra.mxu0 %v2665_v25 }
0x1347   :  { %2691 = vmatprep.subr.mxu0 %v3334_v3 }
0x134b   :  { %v2436_v7 = vpop.permute.xlu0 %2435 }
0x134c   :  { %3186 = vmatmul.mubr.msk.f32.vlgmr.msra.gmra.mxu1 %vm170_vm6, %v2436_v7  ;;  %v2546_v7 = vrot.slane %v3713_v45, 1 }
0x134d   :  { %3196 = vmatprep.mubr.msk.f32.mxu1 %vm3338_vm5, %v3334_v3  ;;  %3189 = vmatpush3.msra.mxu1 %v2760_v61  ;;  %v2758_v61 = vld [vmem:[%s4453_s6 + $0x8] sm:$0xff] }
0x134e   :  { %3190 = vmatprep.subr.mxu1 %v3334_v3 }
0x134f   :  { %3191 = vmatpush3.msra.mxu1 %v2759_v31  ;;  %v2757_v31 = vld [vmem:[%s4453_s6] sm:$0xff] }
0x1350   :  { %3192 = vmatprep.subr.mxu1 %v3334_v3 }
0x1351   :  { %3193 = vmatpush3.msra.mxu1 %v2758_v61 }
0x1352   :  { %3194 = vmatprep.subr.mxu1 %v3334_v3 }
0x1353   :  { %3195 = vmatpush3.msra.mxu1 %v2757_v31 }
0x1403   :  { %v2430_v9 = vpop.f32.mrf.mxu0 }
0x1404   :  { %v2431_v12 = vadd.f32 %v3333_v58, %v2430_v9  ;;  %v2558_v58 = vrot.slane %v3967_v19, 1 }
0x1405   :  { %v3170_v11 = vpop.f32.mrf.mxu0 }
0x140c   :  { %v2505_v13 = vpop.f32.mrf.mxu1 }
0x140d   :  { %v2509_v15 = vadd.f32 %v2505_v13, %v2431_v12 }
0x140e   :  { %v3187_v16 = vpop.f32.mrf.mxu1 }
0x140f   :  { %3302 = vtanh.f32 %v2509_v15 }
0x141c   :  { %v3303_v17 = vpop.eup %3302 }
0x141d   :  { %v2511_v43 = vmul.f32 %v3303_v17, %v3672_v32  ;;  %v3216_v32 = vpack.i.bf16 %v3884_v21, %v3967_v19 }
0x141f   :  { %v4238_v55 = vadd.f32 %v2511_v43, %v3675_v40  ;;  %v3221_v40 = vpack.i.bf16 %v3967_v19, %v4127_v37  ;;  %v3211_v19 = vpack.i.bf16 %v3798_v30, %v3884_v21  ;;  %v2664_v30 = vld [vmem:[%s4452_s5 + $0x68] sm:$0xff]  ;;  %v2663_v21 = vld [vmem:[%s4452_s5 + $0x60] sm:$0xff] }
0x1420   :  { %2692 = vmatpush1.msra.mxu0 %v2664_v30  ;;  %v2660_v37 = vld [vmem:[%s4452_s5 + $0x48] sm:$0xff] }
0x1421   :  { %2515 = vrot.lane.b32.xlu1 %v4238_v55, %s3341_s29  ;;  %v2513_v62 = vmul.f32 %v4238_v55, %v2176_v47  ;;  %2693 = vmatprep.subr.mxu0 %v3334_v3  ;;  %v2670_v47 = vld [vmem:[%s4452_s5 + $0x98] sm:$0xff] }
0x1422   :  { %2694 = vmatpush1.msra.mxu0 %v2663_v21 }
0x1423   :  { %2695 = vmatprep.subr.mxu0 %v3334_v3 }
0x1424   :  { %2696 = vmatpush1.msra.mxu0 %v2662_v29 }
0x1425   :  { %2697 = vmatprep.subr.mxu0 %v3334_v3 }
0x1426   :  { %2698 = vmatpush1.msra.mxu0 %v2661_v34 }
0x1427   :  { %2699 = vmatprep.subr.mxu0 %v3334_v3 }
0x1428   :  { %2700 = vmatpush1.msra.mxu0 %v2660_v37 }
0x1429   :  { %2701 = vmatprep.subr.mxu0 %v3334_v3 }
0x142a   :  { %2702 = vmatpush1.msra.mxu0 %v2659_v42 }
0x142b   :  { %2703 = vmatprep.subr.mxu0 %v3334_v3 }
0x142c   :  { %2704 = vmatpush1.msra.mxu0 %v2658_v27 }
0x142d   :  { %2705 = vmatprep.subr.mxu0 %v3334_v3 }
0x142e   :  { %2706 = vmatpush1.msra.mxu0 %v2657_v8 }
0x142f   :  { %2707 = vmatprep.subr.mxu0 %v3334_v3 }
0x1430   :  { %2708 = vmatpush1.msra.mxu0 %v2656_v0 }
0x1431   :  { %2709 = vmatprep.subr.mxu0 %v3334_v3 }
0x1432   :  { %2710 = vmatpush1.msra.mxu0 %v2655_v1 }
0x1433   :  { %2711 = vmatprep.subr.mxu0 %v3334_v3 }
0x1434   :  { %2712 = vmatpush1.msra.mxu0 %v2654_v2 }
0x1435   :  { %2713 = vmatprep.subr.mxu0 %v3334_v3 }
0x1436   :  { %2714 = vmatpush1.msra.mxu0 %v2653_v22 }
0x1437   :  { %2715 = vmatprep.subr.mxu0 %v3334_v3 }
0x1438   :  { %2716 = vmatpush1.msra.mxu0 %v2652_v26 }
0x1439   :  { %2717 = vmatprep.subr.mxu0 %v3334_v3 }
0x143a   :  { %2718 = vmatpush1.msra.mxu0 %v2651_v4 }
0x143b   :  { %2727 = vmatprep.subr.mxu0 %v3334_v3 }
0x143c   :  { %2728 = vmatpush2.msra.mxu0 %v2678_v24 }
0x143d   :  { %2729 = vmatprep.subr.mxu0 %v3334_v3 }
0x143e   :  { %2730 = vmatpush2.msra.mxu0 %v2677_v6 }
0x143f   :  { %2731 = vmatprep.subr.mxu0 %v3334_v3 }
0x1440   :  { %2732 = vmatpush2.msra.mxu0 %v2676_v14 }
0x1441   :  { %2733 = vmatprep.subr.mxu0 %v3334_v3 }
0x1442   :  { %2734 = vmatpush2.msra.mxu0 %v2675_v53 }
0x1443   :  { %2735 = vmatprep.subr.mxu0 %v3334_v3 }
0x1444   :  { %2736 = vmatpush2.msra.mxu0 %v2674_v54 }
0x1445   :  { %2737 = vmatprep.subr.mxu0 %v3334_v3 }
0x1446   :  { %2738 = vmatpush2.msra.mxu0 %v2673_v36 }
0x1447   :  { %2739 = vmatprep.subr.mxu0 %v3334_v3 }
0x1448   :  { %2740 = vmatpush2.msra.mxu0 %v2672_v38 }
0x1449   :  { %2741 = vmatprep.subr.mxu0 %v3334_v3 }
0x144a   :  { %2742 = vmatpush2.msra.mxu0 %v2671_v39 }
0x144b   :  { %2743 = vmatprep.subr.mxu0 %v3334_v3 }
0x144c   :  { %2744 = vmatpush2.msra.mxu0 %v2670_v47 }
0x144d   :  { %2745 = vmatprep.subr.mxu0 %v3334_v3 }
0x144e   :  { %2746 = vmatpush2.msra.mxu0 %v2669_v44 }
0x144f   :  { %2747 = vmatprep.subr.mxu0 %v3334_v3 }
0x1450   :  { %2748 = vmatpush2.msra.mxu0 %v2668_v59 }
0x1451   :  { %2749 = vmatprep.subr.mxu0 %v3334_v3 }
0x1452   :  { %2750 = vmatpush2.msra.mxu0 %v2667_v48 }
0x1493   :  { %v2516_v52 = vpop.permute.xlu1 %2515 }
0x1494   :  { %v2518_v56 = vmul.f32 %v2516_v52, %v4238_v55 }
0x1496   :  { %2520 = vrot.lane.b32.xlu0 %v2518_v56, %s3342_s30 }
0x149a   :  { %2592 = vrot.lane.b32.xlu0 %v3713_v45, %s3336_s19 }
0x149e   :  { %2612 = vrot.lane.b32.xlu0 %v2550_v46, %s3336_s19 }
0x14a2   :  { %3217 = vrot.lane.b32.xlu0 %v3216_v32, %s3341_s29 }
0x14a6   :  { %2551 = vrot.lane.b32.xlu0 %v2550_v46, %s3342_s30 }
0x14aa   :  { %3222 = vrot.lane.b32.xlu0 %v3221_v40, %s3343_s3 }
0x14ae   :  { %2559 = vrot.lane.b32.xlu0 %v2558_v58, %s3341_s29 }
0x14b2   :  { %2624 = vrot.lane.b32.xlu0 %v2566_v50, %s3343_s3 }
0x14b6   :  { %2567 = vrot.lane.b32.xlu0 %v2566_v50, %s3344_s4 }
0x1508   :  { %v2521_v51 = vpop.permute.xlu0 %2520 }
0x1509   :  { %v2523_v63 = vadd.f32 %v2521_v51, %v2513_v62 }
0x150b   :  { %3304 = vtanh.f32 %v2523_v63 }
0x150c   :  { %v2593_v9 = vpop.permute.xlu0 %2592 }
0x150d   :  { %v2630_v45 = vsel %vm260_vm4, %v2593_v9, %v3803_v41  ;;  %v2894_v9 = vld [vmem:[%s4454_s7 + $0x1] ss:$0 sm:$0xff] }
0x1510   :  { %v2613_v11 = vpop.permute.xlu0 %2612 }
0x1514   :  { %v3218_v13 = vpop.permute.xlu0 %3217 }
0x1515   :  { %v3220_v62 = vunpack.i.h.bf16 %v3218_v13  ;;  %v3219_v51 = vunpack.i.l.bf16 %v3218_v13 }
0x1518   :  { %v3305_v10 = vpop.eup %3304  ;;  %v2552_v15 = vpop.permute.xlu0 %2551 }
0x1519   :  { %2526 = vrot.lane.b32.xlu1 %v3305_v10, %s3341_s29 }
0x151c   :  { %v3223_v17 = vpop.permute.xlu0 %3222 }
0x151d   :  { %3212 = vrot.lane.b32.xlu1 %v3211_v19, %s3345_s20  ;;  %v3224_v30 = vunpack.i.l.bf16 %v3223_v17 }
0x1521   :  { %2615 = vrot.lane.b32.xlu1 %v2554_v18, %s3342_s30 }
0x1525   :  { %2618 = vrot.lane.b32.xlu1 %v2558_v58, %s3345_s20 }
0x1529   :  { %2555 = vrot.lane.b32.xlu1 %v2554_v18, %s3345_s20 }
0x152d   :  { %2621 = vrot.lane.b32.xlu1 %v2562_v23, %s3341_s29 }
0x1531   :  { %3227 = vrot.lane.b32.xlu1 %v3226_v28, %s3344_s4 }
0x1535   :  { %2563 = vrot.lane.b32.xlu1 %v2562_v23, %s3343_s3  ;;  %v3225_v23 = vunpack.i.h.bf16 %v3223_v17 }
0x158b   :  { %v2527_v49 = vpop.permute.xlu1 %2526 }
0x158c   :  { %v4390_v60 = vmul.f32 %v2527_v49, %v4238_v55  ;;  %v2560_v55 = vpop.permute.xlu0 %2559 }
0x158e   :  { %v3231_v5 = vpack.i.bf16 %v4227_v35, %v4390_v60  ;;  %v2571_v57 = vrot.slane %v4390_v60, 1 }
0x158f   :  { %v3213_v12 = vpop.permute.xlu1 %3212 }
0x1590   :  { %3232 = vrot.lane.b32.xlu0 %v3231_v5, %s3339_s21  ;;  %2627 = vrot.lane.b32.xlu1 %v2571_v57, %s3344_s4  ;;  %v2625_v56 = vpop.permute.xlu0 %2624  ;;  %v3215_v46 = vunpack.i.h.bf16 %v3213_v12  ;;  %v3214_v32 = vunpack.i.l.bf16 %v3213_v12 }
0x1592   :  { %v2575_v58 = vsel %vm260_vm4, %v3724_v33, %v3215_v46  ;;  %v2631_v50 = vsel %vm279_vm10, %v2630_v45, %v3214_v32 }
0x1593   :  { %v2616_v35 = vpop.permute.xlu1 %2615  ;;  %v2576_v20 = vsel %vm279_vm10, %v2575_v58, %v3220_v62  ;;  %v2632_v41 = vsel %vm2577_vm11, %v2631_v50, %v3219_v51 }
0x1594   :  { %2547 = vrot.lane.b32.xlu0 %v2546_v7, %s3336_s19  ;;  %2572 = vrot.lane.b32.xlu1 %v2571_v57, %s3339_s21  ;;  %v2637_v63 = vsel %vm260_vm4, %v2613_v11, %v2616_v35  ;;  %v2568_v10 = vpop.permute.xlu0 %2567  ;;  %v2578_v29 = vsel %vm2577_vm11, %v2576_v20, %v3225_v23  ;;  %v2633_v8 = vsel %vm2579_vm12, %v2632_v41, %v3224_v30 }
0x1597   :  { %v2619_v16 = vpop.permute.xlu1 %2618 }
0x1598   :  { %v2638_v19 = vsel %vm279_vm10, %v2637_v63, %v2619_v16 }
0x159b   :  { %v2556_v43 = vpop.permute.xlu1 %2555 }
0x159c   :  { %v2587_v25 = vsel %vm260_vm4, %v2552_v15, %v2556_v43 }
0x159d   :  { %v2588_v34 = vsel %vm279_vm10, %v2587_v25, %v2560_v55 }
0x159f   :  { %v2622_v52 = vpop.permute.xlu1 %2621 }
0x15a0   :  { %v2639_v33 = vsel %vm2577_vm11, %v2638_v19, %v2622_v52 }
0x15a1   :  { %v2640_v42 = vsel %vm2579_vm12, %v2639_v33, %v2625_v56 }
0x15a3   :  { %v3228_v40 = vpop.permute.xlu1 %3227 }
0x15a4   :  { %v3230_v21 = vunpack.i.h.bf16 %v3228_v40  ;;  %v3229_v28 = vunpack.i.l.bf16 %v3228_v40 }
0x15a6   :  { %v2580_v26 = vsel %vm2579_vm12, %v2578_v29, %v3230_v21  ;;  %v2634_v4 = vsel %vm2581_vm13, %v2633_v8, %v3229_v28 }
0x15a7   :  { %v2564_v18 = vpop.permute.xlu1 %2563 }
0x15a8   :  { %v2589_v0 = vsel %vm2577_vm11, %v2588_v34, %v2564_v18 }
0x15a9   :  { %v2590_v38 = vsel %vm2579_vm12, %v2589_v0, %v2568_v10 }
0x1602   :  { %v3233_v37 = vpop.permute.xlu0 %3232  ;;  %v2628_v27 = vpop.permute.xlu1 %2627 }
0x1603   :  { %v3235_v1 = vunpack.i.h.bf16 %v3233_v37  ;;  %v3234_v2 = vunpack.i.l.bf16 %v3233_v37  ;;  %v2641_v22 = vsel %vm2581_vm13, %v2640_v42, %v2628_v27 }
0x1604   :  { %v2645_v14 = vrot.slane %v2641_v22, 7 }
0x1605   :  { %v2582_v24 = vsel %vm2581_vm13, %v2580_v26, %v3235_v1  ;;  %v2635_v6 = vsel %vm2583_vm14, %v2634_v4, %v3234_v2 }
0x1606   :  { %v2548_v53 = vpop.permute.xlu0 %2547  ;;  %v2584_v54 = vsel %vm2583_vm14, %v2582_v24, %v4390_v60  ;;  %v2636_v36 = vsel %vm2585_vm15, %v2635_v6, %v2546_v7  ;;  %v2573_v39 = vpop.permute.xlu1 %2572  ;;  %v2892_v60 = vld [vmem:[%s4454_s7] ss:$0 sm:$0xff] }
0x1607   :  { %v2586_v47 = vsel %vm2585_vm15, %v2584_v54, %v2548_v53  ;;  %v2644_v44 = vrot.slane %v2636_v36, 7  ;;  %v2591_v59 = vsel %vm2581_vm13, %v2590_v38, %v2573_v39 }
0x1608   :  { %v2650_v48 = vsel %vm2648_vm0, %v2591_v59, %v2645_v14 }
0x1609   :  { %2893 = vmatprep.mubr.msk.f32.mxu0 %vm2583_vm14, %v2650_v48  ;;  %v2649_v49 = vsel %vm2648_vm0, %v2586_v47, %v2644_v44 }
0x160a   :  { %2752 = vmatmul.mubr.f32.vlgmr.msra.gmra.mxu0 %v2649_v49 }
0x16ca   :  { %v2753_v5 = vpop.f32.mrf.mxu0 }
0x16cb   :  { %v2754_v57 = vadd.f32 %v2892_v60, %v2753_v5 }
0x16cc   :  { %v2755_v7 = vpop.f32.mrf.mxu0 }
0x16cd   :  { %3197 = vmatmul.mubr.msk.f32.vlgmr.msra.gmra.mxu1 %vm279_vm10, %v2754_v57 }
0x178d   :  { %v2835_v11 = vpop.f32.mrf.mxu1 }
0x178e   :  { %v2836_v3 = vadd.f32 %v2894_v9, %v2835_v11 }
0x178f   :  { %v3198_v12 = vpop.f32.mrf.mxu1 }
0x1790   :  { %2840 = vst.msk [vmem:[%s4455_s8] sm:$0x3] %vm2839_vm1, %v2836_v3 }

</bundles_post_ra>
